<compile_context>
chip_gen: v7x
topology: tpu7x:2x2x1
jax: 0.10.0
libtpu: 0.0.40
codegen_flags: <defaults>
</compile_context>

<pallas_src>
import jax
import jax.numpy as jnp
from jax.experimental import pallas as pl
from jax.experimental.pallas import tpu as pltpu

# ---- model hyper-parameters (small, consistent with the module) -------------
B = 2              # batch
S = 8              # max_sequence_length
D = 32             # embedding_dimension
H = 4              # attention heads
HD = D // H        # head dim
FF = 4 * D         # MLP hidden (= 128, exactly one lane tile)
V = 64             # vocab size
VPAD = 128         # vocab padded to a lane-dense 128 for the output store
N_LAYERS = 2       # config.num_layers
PAD_IDX = 0        # padding token id (embedding row zeroed, like nn.Embedding padding_idx)
EPS = 1e-5
BS = B * S         # folded batch*sequence rows

# rows of the packed per-layer vector tile (L, 8, 128)
ROW_LN1_G, ROW_LN1_B, ROW_LN2_G, ROW_LN2_B = 0, 1, 2, 3
ROW_B_QKV, ROW_B_O, ROW_B_MLP1, ROW_B_MLP2 = 4, 5, 6, 7


# ---------------------------------------------------------------------------
# in-kernel helpers
# ---------------------------------------------------------------------------
def _layer_norm(x, g, b):
    # one-pass: mean and mean-of-squares are independent reductions
    mu = jnp.mean(x, axis=-1, keepdims=True)
    ms = jnp.mean(x * x, axis=-1, keepdims=True)
    var = ms - mu * mu
    return (x - mu) * jax.lax.rsqrt(var + EPS) * g + b


# ---------------------------------------------------------------------------
# fused forward-pass kernel (embeddings + decoder stack + LM head)
# ---------------------------------------------------------------------------
def gpt_forward_kernel(ids_ref, tok_emb_ref, pos_ref, mask_ref,
                       w_qkv_ref, w_o_ref, w1_ref, w2_ref, vecs_ref,
                       lnf_ref, w_vocab_ref, b_vocab_ref, out_ref):
    f32, bf16 = jnp.float32, jnp.bfloat16

    # ---- token embedding via one-hot matmul (MXU) + positional add --------
    ids = ids_ref[...]                                             # (BS, 1) int32
    vocab_iota = jax.lax.broadcasted_iota(jnp.int32, (BS, V), 1)
    onehot = (vocab_iota == ids).astype(f32)                       # (BS, V)
    x = jnp.dot(onehot, tok_emb_ref[...], preferred_element_type=f32)  # (BS, D)
    x = x + pos_ref[...]                                           # pos pre-tiled over batch

    mask_bias = mask_ref[...]                                      # (BS, BS) f32, 0 / -1e30
    scale = jnp.float32(1.0 / (HD ** 0.5))

    for l in range(N_LAYERS):                                      # static unroll
        vec = vecs_ref[l]                                          # (8, 128) f32

        # ---- attention sub-block (pre-LN) ---------------------------------
        xn = _layer_norm(x, vec[ROW_LN1_G:ROW_LN1_G + 1, :D],
                         vec[ROW_LN1_B:ROW_LN1_B + 1, :D])         # (BS, D) f32
        # single fused QKV projection: (BS, D) x (D, 3D)
        qkv = jnp.dot(xn.astype(bf16), w_qkv_ref[l],
                      preferred_element_type=f32) + vec[ROW_B_QKV:ROW_B_QKV + 1, :3 * D]

        # per-head score / context (inherently tiny; static Python loop, no
        # 3-D transposes / relayouts)
        ctx_heads = []
        for h in range(H):
            qh = qkv[:, h * HD:(h + 1) * HD].astype(bf16)                    # (BS, HD)
            kh = qkv[:, D + h * HD:D + (h + 1) * HD].astype(bf16)            # (BS, HD)
            vh = qkv[:, 2 * D + h * HD:2 * D + (h + 1) * HD].astype(bf16)    # (BS, HD)

            s = jnp.einsum('qd,kd->qk', qh, kh,
                           preferred_element_type=f32) * scale + mask_bias   # (BS, BS)
            p = jnp.exp(s - jnp.max(s, axis=-1, keepdims=True))
            p = p * pl.reciprocal(jnp.sum(p, axis=-1, keepdims=True), approx=True)
            ctx_heads.append(jnp.dot(p.astype(bf16), vh,
                                     preferred_element_type=f32))            # (BS, HD)

        ctx = jnp.concatenate(ctx_heads, axis=-1)                  # (BS, D)
        # single fused output projection: (BS, D) x (D, D)
        attn = jnp.dot(ctx.astype(bf16), w_o_ref[l],
                       preferred_element_type=f32) + vec[ROW_B_O:ROW_B_O + 1, :D]
        x = x + attn

        # ---- MLP sub-block (pre-LN) ---------------------------------------
        hn = _layer_norm(x, vec[ROW_LN2_G:ROW_LN2_G + 1, :D],
                         vec[ROW_LN2_B:ROW_LN2_B + 1, :D])
        h = jnp.dot(hn.astype(bf16), w1_ref[l],
                    preferred_element_type=f32) + vec[ROW_B_MLP1:ROW_B_MLP1 + 1, :FF]
        # TODO(synk): PyTorch nn.GELU defaults to exact erf; tanh approximation used here.
        h = jax.nn.gelu(h, approximate=True)
        h = jnp.dot(h.astype(bf16), w2_ref[l],
                    preferred_element_type=f32) + vec[ROW_B_MLP2:ROW_B_MLP2 + 1, :D]
        x = x + h

    # ---- final LN + vocab projection + softmax (lane-dense, VPAD wide) ----
    xf = _layer_norm(x, lnf_ref[0:1, :], lnf_ref[1:2, :])
    logits = jnp.dot(xf.astype(bf16), w_vocab_ref[...],
                     preferred_element_type=f32) + b_vocab_ref[...]  # (BS, VPAD)
    e = jnp.exp(logits - jnp.max(logits, axis=-1, keepdims=True))
    # exact normalization to match F.softmax (padded lanes carry zero mass)
    out_ref[...] = e / jnp.sum(e, axis=-1, keepdims=True)


# ---------------------------------------------------------------------------
# deterministic parameter init (packed / stacked layouts expected by kernel)
# ---------------------------------------------------------------------------
def init_params(key):
    keys = iter(jax.random.split(key, 64))

    def nrm(shape, scale=0.02):
        return (scale * jax.random.normal(next(keys), shape)).astype(jnp.float32)

    tok_emb = nrm((V, D)).at[PAD_IDX].set(0.0)        # padding_idx row zeroed
    pos_emb = nrm((S, D))
    pos_bs = jnp.tile(pos_emb, (B, 1))                # (BS, D) pre-tiled over batch

    # block-diagonal causal mask as an additive f32 bias, precomputed on host
    r = jnp.arange(BS)[:, None]
    c = jnp.arange(BS)[None, :]
    allowed = ((r // S) == (c // S)) & ((c % S) <= (r % S))
    mask_bias = jnp.where(allowed, 0.0, -1e30).astype(jnp.float32)   # (BS, BS)

    w_qkv, w_o, w1, w2, vecs = [], [], [], [], []
    for _ in range(N_LAYERS):
        wq, wk, wv, wo = nrm((D, D)), nrm((D, D)), nrm((D, D)), nrm((D, D))
        # Q|K|V concatenated on the output axis; within each, head h occupies
        # column group h*HD:(h+1)*HD (matches the kernel's head slicing)
        w_qkv.append(jnp.concatenate([wq, wk, wv], axis=-1))       # (D, 3D)
        w_o.append(wo)                                             # (D, D)
        w1.append(nrm((D, FF)))
        w2.append(nrm((FF, D)))
        v = jnp.zeros((8, 128), jnp.float32)
        v = v.at[ROW_LN1_G, :D].set(1.0).at[ROW_LN2_G, :D].set(1.0)  # LN gammas = 1
        vecs.append(v)                                # all biases / betas stay 0

    w_vocab = jnp.zeros((D, VPAD), jnp.float32).at[:, :V].set(nrm((D, V)))
    b_vocab = jnp.concatenate(
        [jnp.zeros((1, V), jnp.float32),
         jnp.full((1, VPAD - V), -1e30, jnp.float32)], axis=1)  # pad lanes -> 0 prob

    return dict(
        tok_emb=tok_emb,                               # (V, D) f32
        pos_bs=pos_bs,                                 # (BS, D) f32
        mask_bias=mask_bias,                           # (BS, BS) f32
        w_qkv=jnp.stack(w_qkv).astype(jnp.bfloat16),   # (L, D, 3D)
        w_o=jnp.stack(w_o).astype(jnp.bfloat16),       # (L, D, D)
        w1=jnp.stack(w1).astype(jnp.bfloat16),         # (L, D, FF)
        w2=jnp.stack(w2).astype(jnp.bfloat16),         # (L, FF, D)
        vecs=jnp.stack(vecs),                          # (L, 8, 128) f32
        lnf=jnp.stack([jnp.ones((D,), jnp.float32),
                       jnp.zeros((D,), jnp.float32)]), # (2, D)
        w_vocab=w_vocab.astype(jnp.bfloat16),          # (D, VPAD)
        b_vocab=b_vocab,                               # (1, VPAD) f32
    )


# ---------------------------------------------------------------------------
# forward pass (targets=None path of GPTModel.forward)
# ---------------------------------------------------------------------------
_VMEM = pl.BlockSpec(memory_space=pltpu.MemorySpace.VMEM)


@jax.jit
def gpt_forward(tokens, params):
    ids = tokens.reshape(BS, 1).astype(jnp.int32)
    probs_padded = pl.pallas_call(
        gpt_forward_kernel,
        out_shape=jax.ShapeDtypeStruct((BS, VPAD), jnp.float32),
        in_specs=[_VMEM] * 12,
        out_specs=_VMEM,
    )(ids, params["tok_emb"], params["pos_bs"], params["mask_bias"],
      params["w_qkv"], params["w_o"], params["w1"], params["w2"],
      params["vecs"], params["lnf"], params["w_vocab"], params["b_vocab"])
    logits = probs_padded.reshape(B, S, VPAD)[:, :, :V]   # drop padded vocab lanes
    loss = None                                           # targets is None
    return logits, loss


# ---------------------------------------------------------------------------
if __name__ == "__main__":
    key = jax.random.PRNGKey(0)
    pkey, tkey = jax.random.split(key)
    params = init_params(pkey)
    tokens = jax.random.randint(tkey, (B, S), 0, V, dtype=jnp.int32)

    logits, loss = gpt_forward(tokens, params)
    logits = jax.block_until_ready(logits)

    assert logits.shape == (B, S, V)
    assert logits.dtype == jnp.float32
    # softmax rows sum to 1 (padded vocab lanes carry exactly zero mass)
    assert bool(jnp.allclose(jnp.sum(logits, axis=-1), 1.0, atol=1e-4))
    assert loss is None

    print("KERNEL_OK")
</pallas_src>

<mosaic_0001>
module attributes {stable_mosaic.version = 11 : i64} {
  func.func @gpt_forward_kernel(%arg0: memref<16x1xi32, #tpu.memory_space<vmem>>, %arg1: memref<64x32xf32, #tpu.memory_space<vmem>>, %arg2: memref<16x32xf32, #tpu.memory_space<vmem>>, %arg3: memref<16x16xf32, #tpu.memory_space<vmem>>, %arg4: memref<2x32x96xbf16, #tpu.memory_space<vmem>>, %arg5: memref<2x32x32xbf16, #tpu.memory_space<vmem>>, %arg6: memref<2x32x128xbf16, #tpu.memory_space<vmem>>, %arg7: memref<2x128x32xbf16, #tpu.memory_space<vmem>>, %arg8: memref<2x8x128xf32, #tpu.memory_space<vmem>>, %arg9: memref<2x32xf32, #tpu.memory_space<vmem>>, %arg10: memref<32x128xbf16, #tpu.memory_space<vmem>>, %arg11: memref<1x128xf32, #tpu.memory_space<vmem>>, %arg12: memref<16x128xf32, #tpu.memory_space<vmem>>) attributes {dimension_semantics = [], scalar_prefetch = 0 : i64, scratch_operands = 0 : i64, tpu.core_type = #tpu.core_type<tc>} {
    %c0 = arith.constant 0 : index
    %c0_0 = arith.constant 0 : index
    %0 = vector.load %arg0[%c0, %c0_0] : memref<16x1xi32, #tpu.memory_space<vmem>>, vector<16x1xi32>
    %1 = tpu.iota {dimensions = array<i32: 1>} : vector<16x64xi32>
    %2 = vector.broadcast %0 : vector<16x1xi32> to vector<16x64xi32>
    %3 = arith.cmpi eq, %1, %2 : vector<16x64xi32>
    %4 = arith.extui %3 : vector<16x64xi1> to vector<16x64xi32>
    %5 = arith.sitofp %4 : vector<16x64xi32> to vector<16x64xf32>
    %c0_1 = arith.constant 0 : index
    %c0_2 = arith.constant 0 : index
    %6 = vector.load %arg1[%c0_1, %c0_2] : memref<64x32xf32, #tpu.memory_space<vmem>>, vector<64x32xf32>
    %cst = arith.constant dense<0.000000e+00> : vector<16x32xf32>
    %7 = tpu.matmul %5, %6, %cst {dimension_numbers = #tpu.dot_dimension_numbers<[1], [0], [0], [1], [0, 0, 1, 1], [], []>} : vector<16x64xf32>, vector<64x32xf32>, vector<16x32xf32> -> vector<16x32xf32>
    %c0_3 = arith.constant 0 : index
    %c0_4 = arith.constant 0 : index
    %8 = vector.load %arg2[%c0_3, %c0_4] : memref<16x32xf32, #tpu.memory_space<vmem>>, vector<16x32xf32>
    %9 = arith.addf %7, %8 : vector<16x32xf32>
    %c0_5 = arith.constant 0 : index
    %c0_6 = arith.constant 0 : index
    %10 = vector.load %arg3[%c0_5, %c0_6] : memref<16x16xf32, #tpu.memory_space<vmem>>, vector<16x16xf32>
    %c0_7 = arith.constant 0 : index
    %c0_8 = arith.constant 0 : index
    %c0_9 = arith.constant 0 : index
    %11 = vector.load %arg8[%c0_7, %c0_8, %c0_9] : memref<2x8x128xf32, #tpu.memory_space<vmem>>, vector<1x8x128xf32>
    %12 = vector.shape_cast %11 : vector<1x8x128xf32> to vector<8x128xf32>
    %13 = vector.extract_strided_slice %12 {offsets = [0, 0], sizes = [1, 32], strides = [1, 1]} : vector<8x128xf32> to vector<1x32xf32>
    %14 = vector.extract_strided_slice %12 {offsets = [1, 0], sizes = [1, 32], strides = [1, 1]} : vector<8x128xf32> to vector<1x32xf32>
    %cst_10 = arith.constant dense<0.000000e+00> : vector<16xf32>
    %15 = vector.multi_reduction <add>, %9, %cst_10 [1] : vector<16x32xf32> to vector<16xf32>
    %16 = vector.shape_cast %15 : vector<16xf32> to vector<16x1xf32>
    %cst_11 = arith.constant 3.200000e+01 : f32
    %17 = vector.broadcast %cst_11 : f32 to vector<16x1xf32>
    %18 = arith.divf %16, %17 : vector<16x1xf32>
    %19 = arith.mulf %9, %9 : vector<16x32xf32>
    %cst_12 = arith.constant dense<0.000000e+00> : vector<16xf32>
    %20 = vector.multi_reduction <add>, %19, %cst_12 [1] : vector<16x32xf32> to vector<16xf32>
    %21 = vector.shape_cast %20 : vector<16xf32> to vector<16x1xf32>
    %cst_13 = arith.constant 3.200000e+01 : f32
    %22 = vector.broadcast %cst_13 : f32 to vector<16x1xf32>
    %23 = arith.divf %21, %22 : vector<16x1xf32>
    %24 = arith.mulf %18, %18 : vector<16x1xf32>
    %25 = arith.subf %23, %24 : vector<16x1xf32>
    %26 = vector.broadcast %18 : vector<16x1xf32> to vector<16x32xf32>
    %27 = arith.subf %9, %26 : vector<16x32xf32>
    %cst_14 = arith.constant 9.99999974E-6 : f32
    %28 = vector.broadcast %cst_14 : f32 to vector<16x1xf32>
    %29 = arith.addf %25, %28 : vector<16x1xf32>
    %30 = math.rsqrt %29 : vector<16x1xf32>
    %31 = vector.broadcast %30 : vector<16x1xf32> to vector<16x32xf32>
    %32 = arith.mulf %27, %31 : vector<16x32xf32>
    %33 = vector.broadcast %13 : vector<1x32xf32> to vector<16x32xf32>
    %34 = arith.mulf %32, %33 : vector<16x32xf32>
    %35 = vector.broadcast %14 : vector<1x32xf32> to vector<16x32xf32>
    %36 = arith.addf %34, %35 : vector<16x32xf32>
    %37 = arith.truncf %36 : vector<16x32xf32> to vector<16x32xbf16>
    %c0_15 = arith.constant 0 : index
    %c0_16 = arith.constant 0 : index
    %c0_17 = arith.constant 0 : index
    %38 = vector.load %arg4[%c0_15, %c0_16, %c0_17] : memref<2x32x96xbf16, #tpu.memory_space<vmem>>, vector<1x32x96xbf16>
    %39 = vector.shape_cast %38 : vector<1x32x96xbf16> to vector<32x96xbf16>
    %cst_18 = arith.constant dense<0.000000e+00> : vector<16x96xf32>
    %40 = tpu.matmul %37, %39, %cst_18 {dimension_numbers = #tpu.dot_dimension_numbers<[1], [0], [0], [1], [0, 0, 1, 1], [], []>} : vector<16x32xbf16>, vector<32x96xbf16>, vector<16x96xf32> -> vector<16x96xf32>
    %41 = vector.extract_strided_slice %12 {offsets = [4, 0], sizes = [1, 96], strides = [1, 1]} : vector<8x128xf32> to vector<1x96xf32>
    %42 = vector.broadcast %41 : vector<1x96xf32> to vector<16x96xf32>
    %43 = arith.addf %40, %42 : vector<16x96xf32>
    %44 = vector.extract_strided_slice %43 {offsets = [0, 0], sizes = [16, 8], strides = [1, 1]} : vector<16x96xf32> to vector<16x8xf32>
    %45 = arith.truncf %44 : vector<16x8xf32> to vector<16x8xbf16>
    %46 = vector.extract_strided_slice %43 {offsets = [0, 32], sizes = [16, 8], strides = [1, 1]} : vector<16x96xf32> to vector<16x8xf32>
    %47 = arith.truncf %46 : vector<16x8xf32> to vector<16x8xbf16>
    %48 = vector.extract_strided_slice %43 {offsets = [0, 64], sizes = [16, 8], strides = [1, 1]} : vector<16x96xf32> to vector<16x8xf32>
    %49 = arith.truncf %48 : vector<16x8xf32> to vector<16x8xbf16>
    "tpu.trace_start"() <{level = 10 : i32, message = "qd,kd->qk"}> : () -> ()
    %cst_19 = arith.constant dense<0.000000e+00> : vector<16x16xf32>
    %50 = tpu.matmul %45, %47, %cst_19 {dimension_numbers = #tpu.dot_dimension_numbers<[1], [1], [0], [0], [0, 0, 1, 0], [], []>} : vector<16x8xbf16>, vector<16x8xbf16>, vector<16x16xf32> -> vector<16x16xf32>
    "tpu.trace_stop"() : () -> ()
    %cst_20 = arith.constant 0.353553385 : f32
    %51 = vector.broadcast %cst_20 : f32 to vector<16x16xf32>
    %52 = arith.mulf %50, %51 : vector<16x16xf32>
    %53 = arith.addf %52, %10 : vector<16x16xf32>
    %cst_21 = arith.constant dense<0xFF800000> : vector<16xf32>
    %54 = vector.multi_reduction <maximumf>, %53, %cst_21 [1] : vector<16x16xf32> to vector<16xf32>
    %55 = vector.shape_cast %54 : vector<16xf32> to vector<16x1xf32>
    %56 = vector.broadcast %55 : vector<16x1xf32> to vector<16x16xf32>
    %57 = arith.subf %53, %56 : vector<16x16xf32>
    %58 = math.exp %57 : vector<16x16xf32>
    %cst_22 = arith.constant dense<0.000000e+00> : vector<16xf32>
    %59 = vector.multi_reduction <add>, %58, %cst_22 [1] : vector<16x16xf32> to vector<16xf32>
    %60 = vector.shape_cast %59 : vector<16xf32> to vector<16x1xf32>
    %61 = tpu.reciprocal %60 {approx = true} : vector<16x1xf32> -> vector<16x1xf32>
    %62 = vector.broadcast %61 : vector<16x1xf32> to vector<16x16xf32>
    %63 = arith.mulf %58, %62 : vector<16x16xf32>
    %64 = arith.truncf %63 : vector<16x16xf32> to vector<16x16xbf16>
    %cst_23 = arith.constant dense<0.000000e+00> : vector<16x8xf32>
    %65 = tpu.matmul %64, %49, %cst_23 {dimension_numbers = #tpu.dot_dimension_numbers<[1], [0], [0], [1], [0, 0, 1, 1], [], []>} : vector<16x16xbf16>, vector<16x8xbf16>, vector<16x8xf32> -> vector<16x8xf32>
    %66 = vector.extract_strided_slice %43 {offsets = [0, 8], sizes = [16, 8], strides = [1, 1]} : vector<16x96xf32> to vector<16x8xf32>
    %67 = arith.truncf %66 : vector<16x8xf32> to vector<16x8xbf16>
    %68 = vector.extract_strided_slice %43 {offsets = [0, 40], sizes = [16, 8], strides = [1, 1]} : vector<16x96xf32> to vector<16x8xf32>
    %69 = arith.truncf %68 : vector<16x8xf32> to vector<16x8xbf16>
    %70 = vector.extract_strided_slice %43 {offsets = [0, 72], sizes = [16, 8], strides = [1, 1]} : vector<16x96xf32> to vector<16x8xf32>
    %71 = arith.truncf %70 : vector<16x8xf32> to vector<16x8xbf16>
    "tpu.trace_start"() <{level = 10 : i32, message = "qd,kd->qk"}> : () -> ()
    %cst_24 = arith.constant dense<0.000000e+00> : vector<16x16xf32>
    %72 = tpu.matmul %67, %69, %cst_24 {dimension_numbers = #tpu.dot_dimension_numbers<[1], [1], [0], [0], [0, 0, 1, 0], [], []>} : vector<16x8xbf16>, vector<16x8xbf16>, vector<16x16xf32> -> vector<16x16xf32>
    "tpu.trace_stop"() : () -> ()
    %cst_25 = arith.constant 0.353553385 : f32
    %73 = vector.broadcast %cst_25 : f32 to vector<16x16xf32>
    %74 = arith.mulf %72, %73 : vector<16x16xf32>
    %75 = arith.addf %74, %10 : vector<16x16xf32>
    %cst_26 = arith.constant dense<0xFF800000> : vector<16xf32>
    %76 = vector.multi_reduction <maximumf>, %75, %cst_26 [1] : vector<16x16xf32> to vector<16xf32>
    %77 = vector.shape_cast %76 : vector<16xf32> to vector<16x1xf32>
    %78 = vector.broadcast %77 : vector<16x1xf32> to vector<16x16xf32>
    %79 = arith.subf %75, %78 : vector<16x16xf32>
    %80 = math.exp %79 : vector<16x16xf32>
    %cst_27 = arith.constant dense<0.000000e+00> : vector<16xf32>
    %81 = vector.multi_reduction <add>, %80, %cst_27 [1] : vector<16x16xf32> to vector<16xf32>
    %82 = vector.shape_cast %81 : vector<16xf32> to vector<16x1xf32>
    %83 = tpu.reciprocal %82 {approx = true} : vector<16x1xf32> -> vector<16x1xf32>
    %84 = vector.broadcast %83 : vector<16x1xf32> to vector<16x16xf32>
    %85 = arith.mulf %80, %84 : vector<16x16xf32>
    %86 = arith.truncf %85 : vector<16x16xf32> to vector<16x16xbf16>
    %cst_28 = arith.constant dense<0.000000e+00> : vector<16x8xf32>
    %87 = tpu.matmul %86, %71, %cst_28 {dimension_numbers = #tpu.dot_dimension_numbers<[1], [0], [0], [1], [0, 0, 1, 1], [], []>} : vector<16x16xbf16>, vector<16x8xbf16>, vector<16x8xf32> -> vector<16x8xf32>
    %88 = vector.extract_strided_slice %43 {offsets = [0, 16], sizes = [16, 8], strides = [1, 1]} : vector<16x96xf32> to vector<16x8xf32>
    %89 = arith.truncf %88 : vector<16x8xf32> to vector<16x8xbf16>
    %90 = vector.extract_strided_slice %43 {offsets = [0, 48], sizes = [16, 8], strides = [1, 1]} : vector<16x96xf32> to vector<16x8xf32>
    %91 = arith.truncf %90 : vector<16x8xf32> to vector<16x8xbf16>
    %92 = vector.extract_strided_slice %43 {offsets = [0, 80], sizes = [16, 8], strides = [1, 1]} : vector<16x96xf32> to vector<16x8xf32>
    %93 = arith.truncf %92 : vector<16x8xf32> to vector<16x8xbf16>
    "tpu.trace_start"() <{level = 10 : i32, message = "qd,kd->qk"}> : () -> ()
    %cst_29 = arith.constant dense<0.000000e+00> : vector<16x16xf32>
    %94 = tpu.matmul %89, %91, %cst_29 {dimension_numbers = #tpu.dot_dimension_numbers<[1], [1], [0], [0], [0, 0, 1, 0], [], []>} : vector<16x8xbf16>, vector<16x8xbf16>, vector<16x16xf32> -> vector<16x16xf32>
    "tpu.trace_stop"() : () -> ()
    %cst_30 = arith.constant 0.353553385 : f32
    %95 = vector.broadcast %cst_30 : f32 to vector<16x16xf32>
    %96 = arith.mulf %94, %95 : vector<16x16xf32>
    %97 = arith.addf %96, %10 : vector<16x16xf32>
    %cst_31 = arith.constant dense<0xFF800000> : vector<16xf32>
    %98 = vector.multi_reduction <maximumf>, %97, %cst_31 [1] : vector<16x16xf32> to vector<16xf32>
    %99 = vector.shape_cast %98 : vector<16xf32> to vector<16x1xf32>
    %100 = vector.broadcast %99 : vector<16x1xf32> to vector<16x16xf32>
    %101 = arith.subf %97, %100 : vector<16x16xf32>
    %102 = math.exp %101 : vector<16x16xf32>
    %cst_32 = arith.constant dense<0.000000e+00> : vector<16xf32>
    %103 = vector.multi_reduction <add>, %102, %cst_32 [1] : vector<16x16xf32> to vector<16xf32>
    %104 = vector.shape_cast %103 : vector<16xf32> to vector<16x1xf32>
    %105 = tpu.reciprocal %104 {approx = true} : vector<16x1xf32> -> vector<16x1xf32>
    %106 = vector.broadcast %105 : vector<16x1xf32> to vector<16x16xf32>
    %107 = arith.mulf %102, %106 : vector<16x16xf32>
    %108 = arith.truncf %107 : vector<16x16xf32> to vector<16x16xbf16>
    %cst_33 = arith.constant dense<0.000000e+00> : vector<16x8xf32>
    %109 = tpu.matmul %108, %93, %cst_33 {dimension_numbers = #tpu.dot_dimension_numbers<[1], [0], [0], [1], [0, 0, 1, 1], [], []>} : vector<16x16xbf16>, vector<16x8xbf16>, vector<16x8xf32> -> vector<16x8xf32>
    %110 = vector.extract_strided_slice %43 {offsets = [0, 24], sizes = [16, 8], strides = [1, 1]} : vector<16x96xf32> to vector<16x8xf32>
    %111 = arith.truncf %110 : vector<16x8xf32> to vector<16x8xbf16>
    %112 = vector.extract_strided_slice %43 {offsets = [0, 56], sizes = [16, 8], strides = [1, 1]} : vector<16x96xf32> to vector<16x8xf32>
    %113 = arith.truncf %112 : vector<16x8xf32> to vector<16x8xbf16>
    %114 = vector.extract_strided_slice %43 {offsets = [0, 88], sizes = [16, 8], strides = [1, 1]} : vector<16x96xf32> to vector<16x8xf32>
    %115 = arith.truncf %114 : vector<16x8xf32> to vector<16x8xbf16>
    "tpu.trace_start"() <{level = 10 : i32, message = "qd,kd->qk"}> : () -> ()
    %cst_34 = arith.constant dense<0.000000e+00> : vector<16x16xf32>
    %116 = tpu.matmul %111, %113, %cst_34 {dimension_numbers = #tpu.dot_dimension_numbers<[1], [1], [0], [0], [0, 0, 1, 0], [], []>} : vector<16x8xbf16>, vector<16x8xbf16>, vector<16x16xf32> -> vector<16x16xf32>
    "tpu.trace_stop"() : () -> ()
    %cst_35 = arith.constant 0.353553385 : f32
    %117 = vector.broadcast %cst_35 : f32 to vector<16x16xf32>
    %118 = arith.mulf %116, %117 : vector<16x16xf32>
    %119 = arith.addf %118, %10 : vector<16x16xf32>
    %cst_36 = arith.constant dense<0xFF800000> : vector<16xf32>
    %120 = vector.multi_reduction <maximumf>, %119, %cst_36 [1] : vector<16x16xf32> to vector<16xf32>
    %121 = vector.shape_cast %120 : vector<16xf32> to vector<16x1xf32>
    %122 = vector.broadcast %121 : vector<16x1xf32> to vector<16x16xf32>
    %123 = arith.subf %119, %122 : vector<16x16xf32>
    %124 = math.exp %123 : vector<16x16xf32>
    %cst_37 = arith.constant dense<0.000000e+00> : vector<16xf32>
    %125 = vector.multi_reduction <add>, %124, %cst_37 [1] : vector<16x16xf32> to vector<16xf32>
    %126 = vector.shape_cast %125 : vector<16xf32> to vector<16x1xf32>
    %127 = tpu.reciprocal %126 {approx = true} : vector<16x1xf32> -> vector<16x1xf32>
    %128 = vector.broadcast %127 : vector<16x1xf32> to vector<16x16xf32>
    %129 = arith.mulf %124, %128 : vector<16x16xf32>
    %130 = arith.truncf %129 : vector<16x16xf32> to vector<16x16xbf16>
    %cst_38 = arith.constant dense<0.000000e+00> : vector<16x8xf32>
    %131 = tpu.matmul %130, %115, %cst_38 {dimension_numbers = #tpu.dot_dimension_numbers<[1], [0], [0], [1], [0, 0, 1, 1], [], []>} : vector<16x16xbf16>, vector<16x8xbf16>, vector<16x8xf32> -> vector<16x8xf32>
    %132 = tpu.concatenate %65, %87, %109, %131 in 1 : vector<16x8xf32>, vector<16x8xf32>, vector<16x8xf32>, vector<16x8xf32> -> vector<16x32xf32>
    %133 = arith.truncf %132 : vector<16x32xf32> to vector<16x32xbf16>
    %c0_39 = arith.constant 0 : index
    %c0_40 = arith.constant 0 : index
    %c0_41 = arith.constant 0 : index
    %134 = vector.load %arg5[%c0_39, %c0_40, %c0_41] : memref<2x32x32xbf16, #tpu.memory_space<vmem>>, vector<1x32x32xbf16>
    %135 = vector.shape_cast %134 : vector<1x32x32xbf16> to vector<32x32xbf16>
    %cst_42 = arith.constant dense<0.000000e+00> : vector<16x32xf32>
    %136 = tpu.matmul %133, %135, %cst_42 {dimension_numbers = #tpu.dot_dimension_numbers<[1], [0], [0], [1], [0, 0, 1, 1], [], []>} : vector<16x32xbf16>, vector<32x32xbf16>, vector<16x32xf32> -> vector<16x32xf32>
    %137 = vector.extract_strided_slice %12 {offsets = [5, 0], sizes = [1, 32], strides = [1, 1]} : vector<8x128xf32> to vector<1x32xf32>
    %138 = vector.broadcast %137 : vector<1x32xf32> to vector<16x32xf32>
    %139 = arith.addf %136, %138 : vector<16x32xf32>
    %140 = arith.addf %9, %139 : vector<16x32xf32>
    %141 = vector.extract_strided_slice %12 {offsets = [2, 0], sizes = [1, 32], strides = [1, 1]} : vector<8x128xf32> to vector<1x32xf32>
    %142 = vector.extract_strided_slice %12 {offsets = [3, 0], sizes = [1, 32], strides = [1, 1]} : vector<8x128xf32> to vector<1x32xf32>
    %cst_43 = arith.constant dense<0.000000e+00> : vector<16xf32>
    %143 = vector.multi_reduction <add>, %140, %cst_43 [1] : vector<16x32xf32> to vector<16xf32>
    %144 = vector.shape_cast %143 : vector<16xf32> to vector<16x1xf32>
    %cst_44 = arith.constant 3.200000e+01 : f32
    %145 = vector.broadcast %cst_44 : f32 to vector<16x1xf32>
    %146 = arith.divf %144, %145 : vector<16x1xf32>
    %147 = arith.mulf %140, %140 : vector<16x32xf32>
    %cst_45 = arith.constant dense<0.000000e+00> : vector<16xf32>
    %148 = vector.multi_reduction <add>, %147, %cst_45 [1] : vector<16x32xf32> to vector<16xf32>
    %149 = vector.shape_cast %148 : vector<16xf32> to vector<16x1xf32>
    %cst_46 = arith.constant 3.200000e+01 : f32
    %150 = vector.broadcast %cst_46 : f32 to vector<16x1xf32>
    %151 = arith.divf %149, %150 : vector<16x1xf32>
    %152 = arith.mulf %146, %146 : vector<16x1xf32>
    %153 = arith.subf %151, %152 : vector<16x1xf32>
    %154 = vector.broadcast %146 : vector<16x1xf32> to vector<16x32xf32>
    %155 = arith.subf %140, %154 : vector<16x32xf32>
    %cst_47 = arith.constant 9.99999974E-6 : f32
    %156 = vector.broadcast %cst_47 : f32 to vector<16x1xf32>
    %157 = arith.addf %153, %156 : vector<16x1xf32>
    %158 = math.rsqrt %157 : vector<16x1xf32>
    %159 = vector.broadcast %158 : vector<16x1xf32> to vector<16x32xf32>
    %160 = arith.mulf %155, %159 : vector<16x32xf32>
    %161 = vector.broadcast %141 : vector<1x32xf32> to vector<16x32xf32>
    %162 = arith.mulf %160, %161 : vector<16x32xf32>
    %163 = vector.broadcast %142 : vector<1x32xf32> to vector<16x32xf32>
    %164 = arith.addf %162, %163 : vector<16x32xf32>
    %165 = arith.truncf %164 : vector<16x32xf32> to vector<16x32xbf16>
    %c0_48 = arith.constant 0 : index
    %c0_49 = arith.constant 0 : index
    %c0_50 = arith.constant 0 : index
    %166 = vector.load %arg6[%c0_48, %c0_49, %c0_50] : memref<2x32x128xbf16, #tpu.memory_space<vmem>>, vector<1x32x128xbf16>
    %167 = vector.shape_cast %166 : vector<1x32x128xbf16> to vector<32x128xbf16>
    %cst_51 = arith.constant dense<0.000000e+00> : vector<16x128xf32>
    %168 = tpu.matmul %165, %167, %cst_51 {dimension_numbers = #tpu.dot_dimension_numbers<[1], [0], [0], [1], [0, 0, 1, 1], [], []>} : vector<16x32xbf16>, vector<32x128xbf16>, vector<16x128xf32> -> vector<16x128xf32>
    %169 = vector.extract_strided_slice %12 {offsets = [6, 0], sizes = [1, 128], strides = [1, 1]} : vector<8x128xf32> to vector<1x128xf32>
    %170 = vector.broadcast %169 : vector<1x128xf32> to vector<16x128xf32>
    %171 = arith.addf %168, %170 : vector<16x128xf32>
    %172 = arith.mulf %171, %171 : vector<16x128xf32>
    %173 = arith.mulf %171, %172 : vector<16x128xf32>
    %cst_52 = arith.constant 4.471500e-02 : f32
    %174 = vector.broadcast %cst_52 : f32 to vector<16x128xf32>
    %175 = arith.mulf %174, %173 : vector<16x128xf32>
    %176 = arith.addf %171, %175 : vector<16x128xf32>
    %cst_53 = arith.constant 0.797884583 : f32
    %177 = vector.broadcast %cst_53 : f32 to vector<16x128xf32>
    %178 = arith.mulf %177, %176 : vector<16x128xf32>
    %179 = math.tanh %178 : vector<16x128xf32>
    %cst_54 = arith.constant 1.000000e+00 : f32
    %180 = vector.broadcast %cst_54 : f32 to vector<16x128xf32>
    %181 = arith.addf %180, %179 : vector<16x128xf32>
    %cst_55 = arith.constant 5.000000e-01 : f32
    %182 = vector.broadcast %cst_55 : f32 to vector<16x128xf32>
    %183 = arith.mulf %182, %181 : vector<16x128xf32>
    %184 = arith.mulf %171, %183 : vector<16x128xf32>
    %185 = arith.truncf %184 : vector<16x128xf32> to vector<16x128xbf16>
    %c0_56 = arith.constant 0 : index
    %c0_57 = arith.constant 0 : index
    %c0_58 = arith.constant 0 : index
    %186 = vector.load %arg7[%c0_56, %c0_57, %c0_58] : memref<2x128x32xbf16, #tpu.memory_space<vmem>>, vector<1x128x32xbf16>
    %187 = vector.shape_cast %186 : vector<1x128x32xbf16> to vector<128x32xbf16>
    %cst_59 = arith.constant dense<0.000000e+00> : vector<16x32xf32>
    %188 = tpu.matmul %185, %187, %cst_59 {dimension_numbers = #tpu.dot_dimension_numbers<[1], [0], [0], [1], [0, 0, 1, 1], [], []>} : vector<16x128xbf16>, vector<128x32xbf16>, vector<16x32xf32> -> vector<16x32xf32>
    %189 = vector.extract_strided_slice %12 {offsets = [7, 0], sizes = [1, 32], strides = [1, 1]} : vector<8x128xf32> to vector<1x32xf32>
    %190 = vector.broadcast %189 : vector<1x32xf32> to vector<16x32xf32>
    %191 = arith.addf %188, %190 : vector<16x32xf32>
    %192 = arith.addf %140, %191 : vector<16x32xf32>
    %c1 = arith.constant 1 : index
    %c0_60 = arith.constant 0 : index
    %c0_61 = arith.constant 0 : index
    %193 = vector.load %arg8[%c1, %c0_60, %c0_61] : memref<2x8x128xf32, #tpu.memory_space<vmem>>, vector<1x8x128xf32>
    %194 = vector.shape_cast %193 : vector<1x8x128xf32> to vector<8x128xf32>
    %195 = vector.extract_strided_slice %194 {offsets = [0, 0], sizes = [1, 32], strides = [1, 1]} : vector<8x128xf32> to vector<1x32xf32>
    %196 = vector.extract_strided_slice %194 {offsets = [1, 0], sizes = [1, 32], strides = [1, 1]} : vector<8x128xf32> to vector<1x32xf32>
    %cst_62 = arith.constant dense<0.000000e+00> : vector<16xf32>
    %197 = vector.multi_reduction <add>, %192, %cst_62 [1] : vector<16x32xf32> to vector<16xf32>
    %198 = vector.shape_cast %197 : vector<16xf32> to vector<16x1xf32>
    %cst_63 = arith.constant 3.200000e+01 : f32
    %199 = vector.broadcast %cst_63 : f32 to vector<16x1xf32>
    %200 = arith.divf %198, %199 : vector<16x1xf32>
    %201 = arith.mulf %192, %192 : vector<16x32xf32>
    %cst_64 = arith.constant dense<0.000000e+00> : vector<16xf32>
    %202 = vector.multi_reduction <add>, %201, %cst_64 [1] : vector<16x32xf32> to vector<16xf32>
    %203 = vector.shape_cast %202 : vector<16xf32> to vector<16x1xf32>
    %cst_65 = arith.constant 3.200000e+01 : f32
    %204 = vector.broadcast %cst_65 : f32 to vector<16x1xf32>
    %205 = arith.divf %203, %204 : vector<16x1xf32>
    %206 = arith.mulf %200, %200 : vector<16x1xf32>
    %207 = arith.subf %205, %206 : vector<16x1xf32>
    %208 = vector.broadcast %200 : vector<16x1xf32> to vector<16x32xf32>
    %209 = arith.subf %192, %208 : vector<16x32xf32>
    %cst_66 = arith.constant 9.99999974E-6 : f32
    %210 = vector.broadcast %cst_66 : f32 to vector<16x1xf32>
    %211 = arith.addf %207, %210 : vector<16x1xf32>
    %212 = math.rsqrt %211 : vector<16x1xf32>
    %213 = vector.broadcast %212 : vector<16x1xf32> to vector<16x32xf32>
    %214 = arith.mulf %209, %213 : vector<16x32xf32>
    %215 = vector.broadcast %195 : vector<1x32xf32> to vector<16x32xf32>
    %216 = arith.mulf %214, %215 : vector<16x32xf32>
    %217 = vector.broadcast %196 : vector<1x32xf32> to vector<16x32xf32>
    %218 = arith.addf %216, %217 : vector<16x32xf32>
    %219 = arith.truncf %218 : vector<16x32xf32> to vector<16x32xbf16>
    %c1_67 = arith.constant 1 : index
    %c0_68 = arith.constant 0 : index
    %c0_69 = arith.constant 0 : index
    %220 = vector.load %arg4[%c1_67, %c0_68, %c0_69] : memref<2x32x96xbf16, #tpu.memory_space<vmem>>, vector<1x32x96xbf16>
    %221 = vector.shape_cast %220 : vector<1x32x96xbf16> to vector<32x96xbf16>
    %cst_70 = arith.constant dense<0.000000e+00> : vector<16x96xf32>
    %222 = tpu.matmul %219, %221, %cst_70 {dimension_numbers = #tpu.dot_dimension_numbers<[1], [0], [0], [1], [0, 0, 1, 1], [], []>} : vector<16x32xbf16>, vector<32x96xbf16>, vector<16x96xf32> -> vector<16x96xf32>
    %223 = vector.extract_strided_slice %194 {offsets = [4, 0], sizes = [1, 96], strides = [1, 1]} : vector<8x128xf32> to vector<1x96xf32>
    %224 = vector.broadcast %223 : vector<1x96xf32> to vector<16x96xf32>
    %225 = arith.addf %222, %224 : vector<16x96xf32>
    %226 = vector.extract_strided_slice %225 {offsets = [0, 0], sizes = [16, 8], strides = [1, 1]} : vector<16x96xf32> to vector<16x8xf32>
    %227 = arith.truncf %226 : vector<16x8xf32> to vector<16x8xbf16>
    %228 = vector.extract_strided_slice %225 {offsets = [0, 32], sizes = [16, 8], strides = [1, 1]} : vector<16x96xf32> to vector<16x8xf32>
    %229 = arith.truncf %228 : vector<16x8xf32> to vector<16x8xbf16>
    %230 = vector.extract_strided_slice %225 {offsets = [0, 64], sizes = [16, 8], strides = [1, 1]} : vector<16x96xf32> to vector<16x8xf32>
    %231 = arith.truncf %230 : vector<16x8xf32> to vector<16x8xbf16>
    "tpu.trace_start"() <{level = 10 : i32, message = "qd,kd->qk"}> : () -> ()
    %cst_71 = arith.constant dense<0.000000e+00> : vector<16x16xf32>
    %232 = tpu.matmul %227, %229, %cst_71 {dimension_numbers = #tpu.dot_dimension_numbers<[1], [1], [0], [0], [0, 0, 1, 0], [], []>} : vector<16x8xbf16>, vector<16x8xbf16>, vector<16x16xf32> -> vector<16x16xf32>
    "tpu.trace_stop"() : () -> ()
    %cst_72 = arith.constant 0.353553385 : f32
    %233 = vector.broadcast %cst_72 : f32 to vector<16x16xf32>
    %234 = arith.mulf %232, %233 : vector<16x16xf32>
    %235 = arith.addf %234, %10 : vector<16x16xf32>
    %cst_73 = arith.constant dense<0xFF800000> : vector<16xf32>
    %236 = vector.multi_reduction <maximumf>, %235, %cst_73 [1] : vector<16x16xf32> to vector<16xf32>
    %237 = vector.shape_cast %236 : vector<16xf32> to vector<16x1xf32>
    %238 = vector.broadcast %237 : vector<16x1xf32> to vector<16x16xf32>
    %239 = arith.subf %235, %238 : vector<16x16xf32>
    %240 = math.exp %239 : vector<16x16xf32>
    %cst_74 = arith.constant dense<0.000000e+00> : vector<16xf32>
    %241 = vector.multi_reduction <add>, %240, %cst_74 [1] : vector<16x16xf32> to vector<16xf32>
    %242 = vector.shape_cast %241 : vector<16xf32> to vector<16x1xf32>
    %243 = tpu.reciprocal %242 {approx = true} : vector<16x1xf32> -> vector<16x1xf32>
    %244 = vector.broadcast %243 : vector<16x1xf32> to vector<16x16xf32>
    %245 = arith.mulf %240, %244 : vector<16x16xf32>
    %246 = arith.truncf %245 : vector<16x16xf32> to vector<16x16xbf16>
    %cst_75 = arith.constant dense<0.000000e+00> : vector<16x8xf32>
    %247 = tpu.matmul %246, %231, %cst_75 {dimension_numbers = #tpu.dot_dimension_numbers<[1], [0], [0], [1], [0, 0, 1, 1], [], []>} : vector<16x16xbf16>, vector<16x8xbf16>, vector<16x8xf32> -> vector<16x8xf32>
    %248 = vector.extract_strided_slice %225 {offsets = [0, 8], sizes = [16, 8], strides = [1, 1]} : vector<16x96xf32> to vector<16x8xf32>
    %249 = arith.truncf %248 : vector<16x8xf32> to vector<16x8xbf16>
    %250 = vector.extract_strided_slice %225 {offsets = [0, 40], sizes = [16, 8], strides = [1, 1]} : vector<16x96xf32> to vector<16x8xf32>
    %251 = arith.truncf %250 : vector<16x8xf32> to vector<16x8xbf16>
    %252 = vector.extract_strided_slice %225 {offsets = [0, 72], sizes = [16, 8], strides = [1, 1]} : vector<16x96xf32> to vector<16x8xf32>
    %253 = arith.truncf %252 : vector<16x8xf32> to vector<16x8xbf16>
    "tpu.trace_start"() <{level = 10 : i32, message = "qd,kd->qk"}> : () -> ()
    %cst_76 = arith.constant dense<0.000000e+00> : vector<16x16xf32>
    %254 = tpu.matmul %249, %251, %cst_76 {dimension_numbers = #tpu.dot_dimension_numbers<[1], [1], [0], [0], [0, 0, 1, 0], [], []>} : vector<16x8xbf16>, vector<16x8xbf16>, vector<16x16xf32> -> vector<16x16xf32>
    "tpu.trace_stop"() : () -> ()
    %cst_77 = arith.constant 0.353553385 : f32
    %255 = vector.broadcast %cst_77 : f32 to vector<16x16xf32>
    %256 = arith.mulf %254, %255 : vector<16x16xf32>
    %257 = arith.addf %256, %10 : vector<16x16xf32>
    %cst_78 = arith.constant dense<0xFF800000> : vector<16xf32>
    %258 = vector.multi_reduction <maximumf>, %257, %cst_78 [1] : vector<16x16xf32> to vector<16xf32>
    %259 = vector.shape_cast %258 : vector<16xf32> to vector<16x1xf32>
    %260 = vector.broadcast %259 : vector<16x1xf32> to vector<16x16xf32>
    %261 = arith.subf %257, %260 : vector<16x16xf32>
    %262 = math.exp %261 : vector<16x16xf32>
    %cst_79 = arith.constant dense<0.000000e+00> : vector<16xf32>
    %263 = vector.multi_reduction <add>, %262, %cst_79 [1] : vector<16x16xf32> to vector<16xf32>
    %264 = vector.shape_cast %263 : vector<16xf32> to vector<16x1xf32>
    %265 = tpu.reciprocal %264 {approx = true} : vector<16x1xf32> -> vector<16x1xf32>
    %266 = vector.broadcast %265 : vector<16x1xf32> to vector<16x16xf32>
    %267 = arith.mulf %262, %266 : vector<16x16xf32>
    %268 = arith.truncf %267 : vector<16x16xf32> to vector<16x16xbf16>
    %cst_80 = arith.constant dense<0.000000e+00> : vector<16x8xf32>
    %269 = tpu.matmul %268, %253, %cst_80 {dimension_numbers = #tpu.dot_dimension_numbers<[1], [0], [0], [1], [0, 0, 1, 1], [], []>} : vector<16x16xbf16>, vector<16x8xbf16>, vector<16x8xf32> -> vector<16x8xf32>
    %270 = vector.extract_strided_slice %225 {offsets = [0, 16], sizes = [16, 8], strides = [1, 1]} : vector<16x96xf32> to vector<16x8xf32>
    %271 = arith.truncf %270 : vector<16x8xf32> to vector<16x8xbf16>
    %272 = vector.extract_strided_slice %225 {offsets = [0, 48], sizes = [16, 8], strides = [1, 1]} : vector<16x96xf32> to vector<16x8xf32>
    %273 = arith.truncf %272 : vector<16x8xf32> to vector<16x8xbf16>
    %274 = vector.extract_strided_slice %225 {offsets = [0, 80], sizes = [16, 8], strides = [1, 1]} : vector<16x96xf32> to vector<16x8xf32>
    %275 = arith.truncf %274 : vector<16x8xf32> to vector<16x8xbf16>
    "tpu.trace_start"() <{level = 10 : i32, message = "qd,kd->qk"}> : () -> ()
    %cst_81 = arith.constant dense<0.000000e+00> : vector<16x16xf32>
    %276 = tpu.matmul %271, %273, %cst_81 {dimension_numbers = #tpu.dot_dimension_numbers<[1], [1], [0], [0], [0, 0, 1, 0], [], []>} : vector<16x8xbf16>, vector<16x8xbf16>, vector<16x16xf32> -> vector<16x16xf32>
    "tpu.trace_stop"() : () -> ()
    %cst_82 = arith.constant 0.353553385 : f32
    %277 = vector.broadcast %cst_82 : f32 to vector<16x16xf32>
    %278 = arith.mulf %276, %277 : vector<16x16xf32>
    %279 = arith.addf %278, %10 : vector<16x16xf32>
    %cst_83 = arith.constant dense<0xFF800000> : vector<16xf32>
    %280 = vector.multi_reduction <maximumf>, %279, %cst_83 [1] : vector<16x16xf32> to vector<16xf32>
    %281 = vector.shape_cast %280 : vector<16xf32> to vector<16x1xf32>
    %282 = vector.broadcast %281 : vector<16x1xf32> to vector<16x16xf32>
    %283 = arith.subf %279, %282 : vector<16x16xf32>
    %284 = math.exp %283 : vector<16x16xf32>
    %cst_84 = arith.constant dense<0.000000e+00> : vector<16xf32>
    %285 = vector.multi_reduction <add>, %284, %cst_84 [1] : vector<16x16xf32> to vector<16xf32>
    %286 = vector.shape_cast %285 : vector<16xf32> to vector<16x1xf32>
    %287 = tpu.reciprocal %286 {approx = true} : vector<16x1xf32> -> vector<16x1xf32>
    %288 = vector.broadcast %287 : vector<16x1xf32> to vector<16x16xf32>
    %289 = arith.mulf %284, %288 : vector<16x16xf32>
    %290 = arith.truncf %289 : vector<16x16xf32> to vector<16x16xbf16>
    %cst_85 = arith.constant dense<0.000000e+00> : vector<16x8xf32>
    %291 = tpu.matmul %290, %275, %cst_85 {dimension_numbers = #tpu.dot_dimension_numbers<[1], [0], [0], [1], [0, 0, 1, 1], [], []>} : vector<16x16xbf16>, vector<16x8xbf16>, vector<16x8xf32> -> vector<16x8xf32>
    %292 = vector.extract_strided_slice %225 {offsets = [0, 24], sizes = [16, 8], strides = [1, 1]} : vector<16x96xf32> to vector<16x8xf32>
    %293 = arith.truncf %292 : vector<16x8xf32> to vector<16x8xbf16>
    %294 = vector.extract_strided_slice %225 {offsets = [0, 56], sizes = [16, 8], strides = [1, 1]} : vector<16x96xf32> to vector<16x8xf32>
    %295 = arith.truncf %294 : vector<16x8xf32> to vector<16x8xbf16>
    %296 = vector.extract_strided_slice %225 {offsets = [0, 88], sizes = [16, 8], strides = [1, 1]} : vector<16x96xf32> to vector<16x8xf32>
    %297 = arith.truncf %296 : vector<16x8xf32> to vector<16x8xbf16>
    "tpu.trace_start"() <{level = 10 : i32, message = "qd,kd->qk"}> : () -> ()
    %cst_86 = arith.constant dense<0.000000e+00> : vector<16x16xf32>
    %298 = tpu.matmul %293, %295, %cst_86 {dimension_numbers = #tpu.dot_dimension_numbers<[1], [1], [0], [0], [0, 0, 1, 0], [], []>} : vector<16x8xbf16>, vector<16x8xbf16>, vector<16x16xf32> -> vector<16x16xf32>
    "tpu.trace_stop"() : () -> ()
    %cst_87 = arith.constant 0.353553385 : f32
    %299 = vector.broadcast %cst_87 : f32 to vector<16x16xf32>
    %300 = arith.mulf %298, %299 : vector<16x16xf32>
    %301 = arith.addf %300, %10 : vector<16x16xf32>
    %cst_88 = arith.constant dense<0xFF800000> : vector<16xf32>
    %302 = vector.multi_reduction <maximumf>, %301, %cst_88 [1] : vector<16x16xf32> to vector<16xf32>
    %303 = vector.shape_cast %302 : vector<16xf32> to vector<16x1xf32>
    %304 = vector.broadcast %303 : vector<16x1xf32> to vector<16x16xf32>
    %305 = arith.subf %301, %304 : vector<16x16xf32>
    %306 = math.exp %305 : vector<16x16xf32>
    %cst_89 = arith.constant dense<0.000000e+00> : vector<16xf32>
    %307 = vector.multi_reduction <add>, %306, %cst_89 [1] : vector<16x16xf32> to vector<16xf32>
    %308 = vector.shape_cast %307 : vector<16xf32> to vector<16x1xf32>
    %309 = tpu.reciprocal %308 {approx = true} : vector<16x1xf32> -> vector<16x1xf32>
    %310 = vector.broadcast %309 : vector<16x1xf32> to vector<16x16xf32>
    %311 = arith.mulf %306, %310 : vector<16x16xf32>
    %312 = arith.truncf %311 : vector<16x16xf32> to vector<16x16xbf16>
    %cst_90 = arith.constant dense<0.000000e+00> : vector<16x8xf32>
    %313 = tpu.matmul %312, %297, %cst_90 {dimension_numbers = #tpu.dot_dimension_numbers<[1], [0], [0], [1], [0, 0, 1, 1], [], []>} : vector<16x16xbf16>, vector<16x8xbf16>, vector<16x8xf32> -> vector<16x8xf32>
    %314 = tpu.concatenate %247, %269, %291, %313 in 1 : vector<16x8xf32>, vector<16x8xf32>, vector<16x8xf32>, vector<16x8xf32> -> vector<16x32xf32>
    %315 = arith.truncf %314 : vector<16x32xf32> to vector<16x32xbf16>
    %c1_91 = arith.constant 1 : index
    %c0_92 = arith.constant 0 : index
    %c0_93 = arith.constant 0 : index
    %316 = vector.load %arg5[%c1_91, %c0_92, %c0_93] : memref<2x32x32xbf16, #tpu.memory_space<vmem>>, vector<1x32x32xbf16>
    %317 = vector.shape_cast %316 : vector<1x32x32xbf16> to vector<32x32xbf16>
    %cst_94 = arith.constant dense<0.000000e+00> : vector<16x32xf32>
    %318 = tpu.matmul %315, %317, %cst_94 {dimension_numbers = #tpu.dot_dimension_numbers<[1], [0], [0], [1], [0, 0, 1, 1], [], []>} : vector<16x32xbf16>, vector<32x32xbf16>, vector<16x32xf32> -> vector<16x32xf32>
    %319 = vector.extract_strided_slice %194 {offsets = [5, 0], sizes = [1, 32], strides = [1, 1]} : vector<8x128xf32> to vector<1x32xf32>
    %320 = vector.broadcast %319 : vector<1x32xf32> to vector<16x32xf32>
    %321 = arith.addf %318, %320 : vector<16x32xf32>
    %322 = arith.addf %192, %321 : vector<16x32xf32>
    %323 = vector.extract_strided_slice %194 {offsets = [2, 0], sizes = [1, 32], strides = [1, 1]} : vector<8x128xf32> to vector<1x32xf32>
    %324 = vector.extract_strided_slice %194 {offsets = [3, 0], sizes = [1, 32], strides = [1, 1]} : vector<8x128xf32> to vector<1x32xf32>
    %cst_95 = arith.constant dense<0.000000e+00> : vector<16xf32>
    %325 = vector.multi_reduction <add>, %322, %cst_95 [1] : vector<16x32xf32> to vector<16xf32>
    %326 = vector.shape_cast %325 : vector<16xf32> to vector<16x1xf32>
    %cst_96 = arith.constant 3.200000e+01 : f32
    %327 = vector.broadcast %cst_96 : f32 to vector<16x1xf32>
    %328 = arith.divf %326, %327 : vector<16x1xf32>
    %329 = arith.mulf %322, %322 : vector<16x32xf32>
    %cst_97 = arith.constant dense<0.000000e+00> : vector<16xf32>
    %330 = vector.multi_reduction <add>, %329, %cst_97 [1] : vector<16x32xf32> to vector<16xf32>
    %331 = vector.shape_cast %330 : vector<16xf32> to vector<16x1xf32>
    %cst_98 = arith.constant 3.200000e+01 : f32
    %332 = vector.broadcast %cst_98 : f32 to vector<16x1xf32>
    %333 = arith.divf %331, %332 : vector<16x1xf32>
    %334 = arith.mulf %328, %328 : vector<16x1xf32>
    %335 = arith.subf %333, %334 : vector<16x1xf32>
    %336 = vector.broadcast %328 : vector<16x1xf32> to vector<16x32xf32>
    %337 = arith.subf %322, %336 : vector<16x32xf32>
    %cst_99 = arith.constant 9.99999974E-6 : f32
    %338 = vector.broadcast %cst_99 : f32 to vector<16x1xf32>
    %339 = arith.addf %335, %338 : vector<16x1xf32>
    %340 = math.rsqrt %339 : vector<16x1xf32>
    %341 = vector.broadcast %340 : vector<16x1xf32> to vector<16x32xf32>
    %342 = arith.mulf %337, %341 : vector<16x32xf32>
    %343 = vector.broadcast %323 : vector<1x32xf32> to vector<16x32xf32>
    %344 = arith.mulf %342, %343 : vector<16x32xf32>
    %345 = vector.broadcast %324 : vector<1x32xf32> to vector<16x32xf32>
    %346 = arith.addf %344, %345 : vector<16x32xf32>
    %347 = arith.truncf %346 : vector<16x32xf32> to vector<16x32xbf16>
    %c1_100 = arith.constant 1 : index
    %c0_101 = arith.constant 0 : index
    %c0_102 = arith.constant 0 : index
    %348 = vector.load %arg6[%c1_100, %c0_101, %c0_102] : memref<2x32x128xbf16, #tpu.memory_space<vmem>>, vector<1x32x128xbf16>
    %349 = vector.shape_cast %348 : vector<1x32x128xbf16> to vector<32x128xbf16>
    %cst_103 = arith.constant dense<0.000000e+00> : vector<16x128xf32>
    %350 = tpu.matmul %347, %349, %cst_103 {dimension_numbers = #tpu.dot_dimension_numbers<[1], [0], [0], [1], [0, 0, 1, 1], [], []>} : vector<16x32xbf16>, vector<32x128xbf16>, vector<16x128xf32> -> vector<16x128xf32>
    %351 = vector.extract_strided_slice %194 {offsets = [6, 0], sizes = [1, 128], strides = [1, 1]} : vector<8x128xf32> to vector<1x128xf32>
    %352 = vector.broadcast %351 : vector<1x128xf32> to vector<16x128xf32>
    %353 = arith.addf %350, %352 : vector<16x128xf32>
    %354 = arith.mulf %353, %353 : vector<16x128xf32>
    %355 = arith.mulf %353, %354 : vector<16x128xf32>
    %cst_104 = arith.constant 4.471500e-02 : f32
    %356 = vector.broadcast %cst_104 : f32 to vector<16x128xf32>
    %357 = arith.mulf %356, %355 : vector<16x128xf32>
    %358 = arith.addf %353, %357 : vector<16x128xf32>
    %cst_105 = arith.constant 0.797884583 : f32
    %359 = vector.broadcast %cst_105 : f32 to vector<16x128xf32>
    %360 = arith.mulf %359, %358 : vector<16x128xf32>
    %361 = math.tanh %360 : vector<16x128xf32>
    %cst_106 = arith.constant 1.000000e+00 : f32
    %362 = vector.broadcast %cst_106 : f32 to vector<16x128xf32>
    %363 = arith.addf %362, %361 : vector<16x128xf32>
    %cst_107 = arith.constant 5.000000e-01 : f32
    %364 = vector.broadcast %cst_107 : f32 to vector<16x128xf32>
    %365 = arith.mulf %364, %363 : vector<16x128xf32>
    %366 = arith.mulf %353, %365 : vector<16x128xf32>
    %367 = arith.truncf %366 : vector<16x128xf32> to vector<16x128xbf16>
    %c1_108 = arith.constant 1 : index
    %c0_109 = arith.constant 0 : index
    %c0_110 = arith.constant 0 : index
    %368 = vector.load %arg7[%c1_108, %c0_109, %c0_110] : memref<2x128x32xbf16, #tpu.memory_space<vmem>>, vector<1x128x32xbf16>
    %369 = vector.shape_cast %368 : vector<1x128x32xbf16> to vector<128x32xbf16>
    %cst_111 = arith.constant dense<0.000000e+00> : vector<16x32xf32>
    %370 = tpu.matmul %367, %369, %cst_111 {dimension_numbers = #tpu.dot_dimension_numbers<[1], [0], [0], [1], [0, 0, 1, 1], [], []>} : vector<16x128xbf16>, vector<128x32xbf16>, vector<16x32xf32> -> vector<16x32xf32>
    %371 = vector.extract_strided_slice %194 {offsets = [7, 0], sizes = [1, 32], strides = [1, 1]} : vector<8x128xf32> to vector<1x32xf32>
    %372 = vector.broadcast %371 : vector<1x32xf32> to vector<16x32xf32>
    %373 = arith.addf %370, %372 : vector<16x32xf32>
    %374 = arith.addf %322, %373 : vector<16x32xf32>
    %c0_112 = arith.constant 0 : index
    %c0_113 = arith.constant 0 : index
    %375 = vector.load %arg9[%c0_112, %c0_113] : memref<2x32xf32, #tpu.memory_space<vmem>>, vector<1x32xf32>
    %c1_114 = arith.constant 1 : index
    %c0_115 = arith.constant 0 : index
    %376 = vector.load %arg9[%c1_114, %c0_115] : memref<2x32xf32, #tpu.memory_space<vmem>>, vector<1x32xf32>
    %cst_116 = arith.constant dense<0.000000e+00> : vector<16xf32>
    %377 = vector.multi_reduction <add>, %374, %cst_116 [1] : vector<16x32xf32> to vector<16xf32>
    %378 = vector.shape_cast %377 : vector<16xf32> to vector<16x1xf32>
    %cst_117 = arith.constant 3.200000e+01 : f32
    %379 = vector.broadcast %cst_117 : f32 to vector<16x1xf32>
    %380 = arith.divf %378, %379 : vector<16x1xf32>
    %381 = arith.mulf %374, %374 : vector<16x32xf32>
    %cst_118 = arith.constant dense<0.000000e+00> : vector<16xf32>
    %382 = vector.multi_reduction <add>, %381, %cst_118 [1] : vector<16x32xf32> to vector<16xf32>
    %383 = vector.shape_cast %382 : vector<16xf32> to vector<16x1xf32>
    %cst_119 = arith.constant 3.200000e+01 : f32
    %384 = vector.broadcast %cst_119 : f32 to vector<16x1xf32>
    %385 = arith.divf %383, %384 : vector<16x1xf32>
    %386 = arith.mulf %380, %380 : vector<16x1xf32>
    %387 = arith.subf %385, %386 : vector<16x1xf32>
    %388 = vector.broadcast %380 : vector<16x1xf32> to vector<16x32xf32>
    %389 = arith.subf %374, %388 : vector<16x32xf32>
    %cst_120 = arith.constant 9.99999974E-6 : f32
    %390 = vector.broadcast %cst_120 : f32 to vector<16x1xf32>
    %391 = arith.addf %387, %390 : vector<16x1xf32>
    %392 = math.rsqrt %391 : vector<16x1xf32>
    %393 = vector.broadcast %392 : vector<16x1xf32> to vector<16x32xf32>
    %394 = arith.mulf %389, %393 : vector<16x32xf32>
    %395 = vector.broadcast %375 : vector<1x32xf32> to vector<16x32xf32>
    %396 = arith.mulf %394, %395 : vector<16x32xf32>
    %397 = vector.broadcast %376 : vector<1x32xf32> to vector<16x32xf32>
    %398 = arith.addf %396, %397 : vector<16x32xf32>
    %399 = arith.truncf %398 : vector<16x32xf32> to vector<16x32xbf16>
    %c0_121 = arith.constant 0 : index
    %c0_122 = arith.constant 0 : index
    %400 = vector.load %arg10[%c0_121, %c0_122] : memref<32x128xbf16, #tpu.memory_space<vmem>>, vector<32x128xbf16>
    %cst_123 = arith.constant dense<0.000000e+00> : vector<16x128xf32>
    %401 = tpu.matmul %399, %400, %cst_123 {dimension_numbers = #tpu.dot_dimension_numbers<[1], [0], [0], [1], [0, 0, 1, 1], [], []>} : vector<16x32xbf16>, vector<32x128xbf16>, vector<16x128xf32> -> vector<16x128xf32>
    %c0_124 = arith.constant 0 : index
    %c0_125 = arith.constant 0 : index
    %402 = vector.load %arg11[%c0_124, %c0_125] : memref<1x128xf32, #tpu.memory_space<vmem>>, vector<1x128xf32>
    %403 = vector.broadcast %402 : vector<1x128xf32> to vector<16x128xf32>
    %404 = arith.addf %401, %403 : vector<16x128xf32>
    %cst_126 = arith.constant dense<0xFF800000> : vector<16xf32>
    %405 = vector.multi_reduction <maximumf>, %404, %cst_126 [1] : vector<16x128xf32> to vector<16xf32>
    %406 = vector.shape_cast %405 : vector<16xf32> to vector<16x1xf32>
    %407 = vector.broadcast %406 : vector<16x1xf32> to vector<16x128xf32>
    %408 = arith.subf %404, %407 : vector<16x128xf32>
    %409 = math.exp %408 : vector<16x128xf32>
    %cst_127 = arith.constant dense<0.000000e+00> : vector<16xf32>
    %410 = vector.multi_reduction <add>, %409, %cst_127 [1] : vector<16x128xf32> to vector<16xf32>
    %411 = vector.shape_cast %410 : vector<16xf32> to vector<16x1xf32>
    %412 = vector.broadcast %411 : vector<16x1xf32> to vector<16x128xf32>
    %413 = arith.divf %409, %412 : vector<16x128xf32>
    %c0_128 = arith.constant 0 : index
    %c0_129 = arith.constant 0 : index
    %414 = vector.load %arg12[%c0_128, %c0_129] : memref<16x128xf32, #tpu.memory_space<vmem>>, vector<16x128xf32>
    tpu.vector_store %arg12[%c0_128, %c0_129], %413 {strides = array<i32>} : memref<16x128xf32, #tpu.memory_space<vmem>>, vector<16x128xf32>,
    return
  }
}

</mosaic_0001>

<bundles_post_ra>
// kernel: gpt_forward.1
= control target key start
LH: loop header
LB: loop body
LE: loop exit
PB: predicated region body
PF: predicated region fallthrough
CT: control target
= control target key end

     0   :  { %v2798_v2 = vmov 0   ;;  %v2799_v11 = vmov 0.0   ;;  %s3441_s0 = inlined_call_operand.vmem [shape: s32[16,1], index: 0, kind: input, shape index: {}]   ;;  %s3442_s1 = inlined_call_operand.vmem [shape: f32[64,32], index: 1, kind: input, shape index: {}]   ;;  %s3443_s2 = inlined_call_operand.vmem [shape: f32[16,32], index: 2, kind: input, shape index: {}]   ;;  %s3444_s3 = inlined_call_operand.vmem [shape: f32[16,16], index: 3, kind: input, shape index: {}]   ;;  %s3445_s4 = inlined_call_operand.vmem [shape: bf16[2,32,96], index: 4, kind: input, shape index: {}]   ;;  %s3446_s5 = inlined_call_operand.vmem [shape: bf16[2,32,32], index: 5, kind: input, shape index: {}]   ;;  %s3447_s6 = inlined_call_operand.vmem [shape: bf16[2,32,128], index: 6, kind: input, shape index: {}]   ;;  %s3448_s7 = inlined_call_operand.vmem [shape: bf16[2,128,32], index: 7, kind: input, shape index: {}]   ;;  %s3449_s8 = inlined_call_operand.vmem [shape: f32[2,8,128], index: 8, kind: input, shape index: {}]   ;;  %s3450_s9 = inlined_call_operand.vmem [shape: f32[2,32], index: 9, kind: input, shape index: {}]   ;;  %s3451_s10 = inlined_call_operand.vmem [shape: bf16[32,128], index: 10, kind: input, shape index: {}]   ;;  %s3452_s11 = inlined_call_operand.vmem [shape: f32[1,128], index: 11, kind: input, shape index: {}]   ;;  %s3453_s12 = inlined_call_operand.hbm [shape: f32[16,128], index: 12, kind: output, shape index: {}]  }
   0x1   :  { %v43_v0 = vld [vmem:[%s3441_s0] sm:$0xff]  ;;  %2611 = vset.pattern.permute.xlu0 %v2798_v2  ;;  %v60_v3 = vld [vmem:[%s3442_s1 + $0x8] sm:$0xff]  ;;  %v61_v4 = vld [vmem:[%s3442_s1 + $0x10] sm:$0xff]  ;;  %2384 = vmatprep.subr.bf16.mxu1 %v2799_v11 }
   0x2   :  { %v59_v1 = vld [vmem:[%s3442_s1] sm:$0xff]  ;;  %v62_v5 = vld [vmem:[%s3442_s1 + $0x18] sm:$0xff]  ;;  %48 = vperm.xlu0 %2611, %v43_v0   ;;  %v44_v6 = vld [vmem:[%s3441_s0 + $0x8] sm:$0xff] }
   0x3   :  { %v2576_v7 = vpack.c.bf16 %v60_v3, %v59_v1  ;;  %v2580_v8 = vpack.c.bf16 %v62_v5, %v61_v4  ;;  %v63_v9 = vld [vmem:[%s3442_s1 + $0x20] sm:$0xff]  ;;  %v64_v10 = vld [vmem:[%s3442_s1 + $0x28] sm:$0xff]  ;;  %v65_v12 = vld [vmem:[%s3442_s1 + $0x30] sm:$0xff] }
   0x4   :  { %v66_v13 = vld [vmem:[%s3442_s1 + $0x38] sm:$0xff]  ;;  %v2584_v14 = vpack.c.bf16 %v64_v10, %v63_v9 }
   0x5   :  { %2577 = vmatprep.subr.bf16.mxu0 %v2576_v7  ;;  %v2588_v15 = vpack.c.bf16 %v66_v13, %v65_v12 }
   0x6   :  { %2579 = vmatpush3.bf16.msra.mxu0 %v2576_v7  ;;  %51 = vperm.xlu0 %2611, %v44_v6  }
   0x7   :  { %2581 = vmatprep.subr.bf16.mxu0 %v2580_v8 }
   0xa   :  { %2583 = vmatpush3.bf16.msra.mxu0 %v2580_v8 }
   0xb   :  { %2585 = vmatprep.subr.bf16.mxu0 %v2584_v14 }
   0xe   :  { %2587 = vmatpush3.bf16.msra.mxu0 %v2584_v14 }
   0xf   :  { %2589 = vmatprep.subr.bf16.mxu0 %v2588_v15 }
  0x12   :  { %2591 = vmatpush3.bf16.msra.mxu0 %v2588_v15 }
  0x13   :  { %2410 = vmatprep.subr.bf16.mxu0 %v2799_v11 }
  0x14   :  { %17 = vsyncpa [#allocation3], 0  ;;  %v45_v16 = vlaneseq  ;;  %vm69_vm0 = vcmask 523264   ;;  %v68_v22 = vld [vmem:[%s3443_s2 + $0x8] sm:$0xff]  ;;  %v67_v23 = vld [vmem:[%s3443_s2] sm:$0xff]  ;;  %vm154_vm3 = vcmask 261120  }
  0x15   :  { %v2642_v34 = vld [vmem:[%s3445_s4] sm:$0xff]   ;;  %v2643_v35 = vld [vmem:[%s3445_s4 + $0x8] sm:$0xff]   ;;  %vm2800_vm4 = vmmov 0   ;;  %s2801_s30 = smov 96   ;;  %vm267_vm5 = vcmask 64512   ;;  %vm319_vm6 = vcmask 130048  }
  0x16   :  { %v46_v17 = vand.u32 127, %v45_v16  ;;  %2385 = vmatpush3.bf16.msra.mxu1 %v2642_v34  ;;  %2388 = vmatprep.mubr.msk.bf16.mxu1 %vm2800_vm4, %v2799_v11  ;;  %v2948_v50 = vshrl.u32 %v45_v16, 7  ;;  %v2954_v52 = vld [vmem:[%s3449_s8] sm:$0xff]  ;;  %s2802_s17 = smov 88   ;;  %s2803_s18 = smov 72   ;;  %vm793_vm7 = vcmask 195584  }
  0x17   :  { %2386 = vmatprep.subr.bf16.mxu1 %v2799_v11  ;;  %v2985_v16 = vld [vmem:[%s3444_s3] sm:$0xff]  ;;  %s2804_s19 = smov 64   ;;  %s2805_s20 = smov 120  }
  0x18   :  { %v188_v51 = vsub.s32 0, %v2948_v50  ;;  %v194_v54 = vsub.s32 1, %v2948_v50  ;;  %v205_v3 = vsub.s32 4, %v2948_v50  ;;  %s2806_s0 = smov 80   ;;  %s2807_s21 = smov 112  }
  0x19   :  { %s2808_s1 = smov 104   ;;  %s2809_s22 = smov 48  }
  0x1a   :  { %2387 = vmatpush3.bf16.msra.mxu1 %v2643_v35  ;;  %v189_v53 = vrot.slane %v2954_v52, %v188_v51  ;;  %v195_v60 = vrot.slane %v2954_v52, %v194_v54  ;;  %v206_v4 = vrot.slane %v2954_v52, %v205_v3  ;;  %s2810_s23 = smov 56   ;;  %s2811_s24 = smov 40  }
  0x1b   :  { %2392 = vmatprep.subr.bf16.mxu1 %v2799_v11  ;;  %s2812_s26 = smov 8   ;;  %s2813_s27 = smov 16  }
  0x1c   :  { %s2814_s13 = smov 24  }
  0x81   :  { %v49_v18 = vpop.permute.xlu0 %48 }
  0x82   :  { %vm53_vm1 = vcmp.eq.s32.totalorder %v46_v17, %v49_v18 }
  0x83   :  { %v2195_v19 = vsel %vm53_vm1, 1.0, %v2799_v11 }
  0x84   :  { %2381 = vmatprep.mubr.msk.f32.mxu0 %vm69_vm0, %v2195_v19 }
  0x85   :  { %v52_v20 = vpop.permute.xlu0 %51 }
  0x86   :  { %vm54_vm2 = vcmp.eq.s32.totalorder %v46_v17, %v52_v20  ;;  %v2990_v20 = vld [vmem:[%s3444_s3 + $0x8] sm:$0xff] }
  0x87   :  { %v2196_v21 = vsel %vm54_vm2, 1.0, %v2799_v11 }
  0x88   :  { %2382 = vmatmul.mubr.msk.f32.vlgmr.msra.gmra.mrb[0].mxu0 %vm69_vm0, %v2196_v21 }
  0x89   :  { %2412 = vmatprep.mubr.msk.bf16.mxu0 %vm2800_vm4, %v2799_v11 }
 0x15b   :  { %v2383_v24 = vpop.f32.mrb[0].mxu0 }
 0x15c   :  { %v2922_v25 = vadd.f32 %v2383_v24, %v68_v22  ;;  %v142_v26 = vpop.f32.mrb[1].mxu0 }
 0x15d   :  { %v2924_v27 = vadd.f32 %v142_v26, %v67_v23 }
 0x15e   :  { %v158_v28 = vsel %vm154_vm3, %v2922_v25, 0.0  ;;  %v165_v32 = vmul.f32 %v2922_v25, %v2922_v25 }
 0x15f   :  { %159 = vadd.xlane.f32.xlu1 %v158_v28  ;;  %v164_v29 = vmul.f32 %v2924_v27, %v2924_v27  ;;  %v155_v31 = vsel %vm154_vm3, %v2924_v27, 0.0 }
 0x160   :  { %v169_v33 = vsel %vm154_vm3, %v165_v32, 0.0 }
 0x161   :  { %v166_v30 = vsel %vm154_vm3, %v164_v29, 0.0 }
 0x162   :  { %167 = vadd.xlane.f32.xlu0 %v166_v30 }
 0x163   :  { %156 = vadd.xlane.f32.xlu1 %v155_v31 }
 0x167   :  { %170 = vadd.xlane.f32.xlu1 %v169_v33 }
 0x1ec   :  { %v160_v36 = vpop.xlane.xlu1 %159 }
 0x1ed   :  { %v163_v39 = vmul.f32 0.03125, %v160_v36 }
 0x1ef   :  { %v168_v37 = vpop.xlane.xlu0 %167  ;;  %v175_v44 = vmul.f32 %v163_v39, %v163_v39  ;;  %v179_v57 = vsub.f32 %v2922_v25, %v163_v39 }
 0x1f0   :  { %v157_v38 = vpop.xlane.xlu1 %156  ;;  %v172_v41 = vmul.f32 0.03125, %v168_v37 }
 0x1f1   :  { %v162_v40 = vmul.f32 0.03125, %v157_v38 }
 0x1f3   :  { %v174_v42 = vmul.f32 %v162_v40, %v162_v40  ;;  %v178_v55 = vsub.f32 %v2924_v27, %v162_v40 }
 0x1f4   :  { %v171_v43 = vpop.xlane.xlu1 %170 }
 0x1f5   :  { %v176_v45 = vsub.f32 %v172_v41, %v174_v42  ;;  %v173_v46 = vmul.f32 0.03125, %v171_v43 }
 0x1f7   :  { %v180_v47 = vadd.f32 1e-05, %v176_v45  ;;  %v177_v48 = vsub.f32 %v173_v46, %v175_v44 }
 0x1f9   :  { %2672 = vrsqrt.f32 %v180_v47  ;;  %v181_v49 = vadd.f32 1e-05, %v177_v48 }
 0x1fb   :  { %2674 = vrsqrt.f32 %v181_v49 }
 0x203   :  { %v2673_v56 = vpop.eup %2672 }
 0x204   :  { %v184_v58 = vmul.f32 %v2673_v56, %v178_v55 }
 0x205   :  { %v2675_v59 = vpop.eup %2674 }
 0x206   :  { %v190_v61 = vmul.f32 %v189_v53, %v184_v58  ;;  %v185_v62 = vmul.f32 %v2675_v59, %v179_v57 }
 0x208   :  { %v191_v63 = vmul.f32 %v189_v53, %v185_v62  ;;  %v196_v0 = vadd.f32 %v195_v60, %v190_v61 }
 0x20a   :  { %v197_v1 = vadd.f32 %v195_v60, %v191_v63 }
 0x20c   :  { %v198_v2 = vpack.c.bf16 %v197_v1, %v196_v0 }
 0x20e   :  { %2389 = vmatmul.mubr.msk.bf16.vlgmr.msra.gmra.mrb[0].mxu1 %vm154_vm3, %v198_v2 }
 0x20f   :  { %2394 = vmatprep.mubr.msk.bf16.mxu1 %vm2800_vm4, %v2799_v11 }
 0x2e1   :  { %v256_v5 = vpop.f32.mrb[0].mxu1 }
 0x2e2   :  { %v2390_v6 = vpop.f32.mrb[1].mxu1  ;;  %v257_v8 = vadd.f32 %v256_v5, %v206_v4 }
 0x2e3   :  { %v259_v7 = vpop.f32.mrb[2].mxu1 }
 0x2e4   :  { %v260_v9 = vadd.f32 %v259_v7, %v206_v4  ;;  %v2391_v10 = vpop.f32.mrb[3].mxu1 }
 0x2e6   :  { %v2972_v12 = vpack.c.bf16 %v260_v9, %v257_v8 }
 0x2e8   :  { %265 = vrot.lane.b32.xlu1 %v2972_v12, %s2801_s30 }
 0x35a   :  { %v266_v13 = vpop.permute.xlu1 %265 }
 0x35b   :  { %v272_v14 = vsel %vm267_vm5, %v266_v13, 0 }
 0x35c   :  { %2393 = vmatpush3.bf16.xpose.msra.mxu1 %v272_v14 }
 0x35d   :  { %2398 = vmatprep.subr.bf16.mxu1 %v2799_v11 }
 0x363   :  { %2395 = vmatmul.mubr.msk.bf16.vlgmr.msra.gmra.mrb[4].mxu1 %vm267_vm5, %v2972_v12 }
 0x364   :  { %2400 = vmatprep.mubr.msk.bf16.mxu1 %vm2800_vm4, %v2799_v11 }
 0x436   :  { %v308_v15 = vpop.f32.mrb[4].mxu1 }
 0x437   :  { %v315_v17 = vmul.f32 0.35355338, %v308_v15  ;;  %v2396_v18 = vpop.f32.mrb[5].mxu1 }
 0x438   :  { %v311_v19 = vpop.f32.mrb[6].mxu1 }
 0x439   :  { %v316_v21 = vmul.f32 0.35355338, %v311_v19  ;;  %v2397_v22 = vpop.f32.mrb[7].mxu1  ;;  %v317_v23 = vadd.f32 %v315_v17, %v2985_v16 }
 0x43b   :  { %v320_v24 = vsel %vm319_vm6, %v317_v23, -inf  ;;  %v318_v26 = vadd.f32 %v316_v21, %v2990_v20 }
 0x43c   :  { %321 = vmax.xlane.f32.xlu1 %v320_v24 }
 0x43d   :  { %v323_v28 = vsel %vm319_vm6, %v318_v26, -inf }
 0x43e   :  { %324 = vmax.xlane.f32.xlu0 %v323_v28 }
 0x44d   :  { %392 = vrot.lane.b32.xlu1 %v2972_v12, %s2802_s17 }
 0x451   :  { %642 = vrot.lane.b32.xlu1 %v2972_v12, %s2803_s18 }
 0x4c9   :  { %v322_v29 = vpop.xlane.xlu1 %321 }
 0x4ca   :  { %v326_v30 = vsub.f32 %v317_v23, %v322_v29 }
 0x4cb   :  { %v325_v31 = vpop.xlane.xlu0 %324 }
 0x4cc   :  { %v328_v32 = vmul.f32 1.442695, %v326_v30  ;;  %v327_v33 = vsub.f32 %v318_v26, %v325_v31 }
 0x4cd   :  { %v393_v46 = vpop.permute.xlu1 %392 }
 0x4ce   :  { %2676 = vpow2.f32 %v328_v32  ;;  %v330_v34 = vmul.f32 1.442695, %v327_v33  ;;  %v398_v49 = vsel %vm267_vm5, %v393_v46, 0 }
 0x4d0   :  { %2678 = vpow2.f32 %v330_v34 }
 0x4d1   :  { %v643_v56 = vpop.permute.xlu1 %642 }
 0x4d2   :  { %v648_v58 = vsel %vm267_vm5, %v643_v56, 0 }
 0x4d8   :  { %v2677_v35 = vpop.eup %2676 }
 0x4d9   :  { %v332_v36 = vsel %vm319_vm6, %v2677_v35, 0.0 }
 0x4da   :  { %v2679_v37 = vpop.eup %2678  ;;  %333 = vadd.xlane.f32.xlu0 %v332_v36 }
 0x4db   :  { %v335_v38 = vsel %vm319_vm6, %v2679_v37, 0.0 }
 0x4de   :  { %336 = vadd.xlane.f32.xlu0 %v335_v38 }
 0x4f4   :  { %343 = vrot.lane.b32.xlu0 %v2972_v12, %s2804_s19 }
 0x4f8   :  { %390 = vrot.lane.b32.xlu0 %v2972_v12, %s2805_s20 }
 0x4fc   :  { %517 = vrot.lane.b32.xlu0 %v2972_v12, %s2806_s0 }
 0x500   :  { %515 = vrot.lane.b32.xlu0 %v2972_v12, %s2807_s21 }
 0x504   :  { %640 = vrot.lane.b32.xlu0 %v2972_v12, %s2808_s1 }
 0x567   :  { %v334_v39 = vpop.xlane.xlu0 %333 }
 0x568   :  { %2680 = vrcp.f32 %v334_v39 }
 0x56b   :  { %v337_v40 = vpop.xlane.xlu0 %336 }
 0x56c   :  { %2682 = vrcp.f32 %v337_v40 }
 0x56f   :  { %v344_v41 = vpop.permute.xlu0 %343 }
 0x570   :  { %2399 = vmatpush3.bf16.msra.mxu1 %v344_v41 }
 0x571   :  { %2404 = vmatprep.subr.bf16.mxu1 %v2799_v11 }
 0x572   :  { %v2681_v42 = vpop.eup %2680 }
 0x573   :  { %v340_v44 = vmul.f32 %v2681_v42, %v2677_v35  ;;  %v391_v48 = vpop.permute.xlu0 %390 }
 0x576   :  { %v2683_v43 = vpop.eup %2682 }
 0x577   :  { %v341_v45 = vmul.f32 %v2683_v43, %v2679_v37  ;;  %v518_v53 = vpop.permute.xlu0 %517 }
 0x578   :  { %v523_v55 = vsel %vm267_vm5, %v518_v53, 0 }
 0x579   :  { %v342_v47 = vpack.c.bf16 %v341_v45, %v340_v44 }
 0x57b   :  { %2401 = vmatmul.mubr.msk.bf16.vlgmr.msra.gmra.mrb[8].mxu1 %vm319_vm6, %v342_v47  ;;  %v516_v57 = vpop.permute.xlu0 %515 }
 0x57c   :  { %2405 = vmatpush3.bf16.xpose.msra.mxu1 %v398_v49  ;;  %2406 = vmatprep.mubr.msk.bf16.mxu1 %vm2800_vm4, %v2799_v11 }
 0x57d   :  { %2416 = vmatprep.subr.bf16.mxu1 %v2799_v11 }
 0x57f   :  { %v641_v59 = vpop.permute.xlu0 %640 }
 0x583   :  { %2407 = vmatmul.mubr.msk.bf16.vlgmr.msra.gmra.mrb[12].mxu1 %vm267_vm5, %v391_v48 }
 0x584   :  { %2417 = vmatpush3.bf16.xpose.msra.mxu1 %v523_v55  ;;  %2418 = vmatprep.mubr.msk.bf16.mxu1 %vm2800_vm4, %v2799_v11 }
 0x585   :  { %2428 = vmatprep.subr.bf16.mxu1 %v2799_v11 }
 0x58b   :  { %2419 = vmatmul.mubr.msk.bf16.vlgmr.msra.gmra.mrb[16].mxu1 %vm267_vm5, %v516_v57 }
 0x58c   :  { %2429 = vmatpush3.bf16.xpose.msra.mxu1 %v648_v58  ;;  %2430 = vmatprep.mubr.msk.bf16.mxu1 %vm2800_vm4, %v2799_v11 }
 0x58d   :  { %2440 = vmatprep.subr.bf16.mxu1 %v2799_v11 }
 0x593   :  { %2431 = vmatmul.mubr.msk.bf16.vlgmr.msra.gmra.mrb[20].mxu1 %vm267_vm5, %v641_v59 }
 0x594   :  { %2444 = vmatprep.mubr.msk.bf16.mxu1 %vm2800_vm4, %v2799_v11 }
 0x64e   :  { %v3031_v60 = vpop.f32.mrb[8].mxu1 }
 0x64f   :  { %v2402_v61 = vpop.f32.mrb[9].mxu1 }
 0x650   :  { %v3033_v62 = vpop.f32.mrb[10].mxu1 }
 0x651   :  { %v2403_v63 = vpop.f32.mrb[11].mxu1 }
 0x656   :  { %v434_v0 = vpop.f32.mrb[12].mxu1 }
 0x657   :  { %v441_v1 = vmul.f32 0.35355338, %v434_v0  ;;  %v2408_v2 = vpop.f32.mrb[13].mxu1 }
 0x658   :  { %v437_v4 = vpop.f32.mrb[14].mxu1 }
 0x659   :  { %v442_v5 = vmul.f32 0.35355338, %v437_v4  ;;  %v2409_v6 = vpop.f32.mrb[15].mxu1  ;;  %v443_v7 = vadd.f32 %v441_v1, %v2985_v16 }
 0x65b   :  { %v445_v8 = vsel %vm319_vm6, %v443_v7, -inf  ;;  %v444_v9 = vadd.f32 %v442_v5, %v2990_v20 }
 0x65c   :  { %446 = vmax.xlane.f32.xlu1 %v445_v8 }
 0x65d   :  { %v448_v10 = vsel %vm319_vm6, %v444_v9, -inf }
 0x65e   :  { %449 = vmax.xlane.f32.xlu0 %v448_v10  ;;  %v559_v13 = vpop.f32.mrb[16].mxu1 }
 0x65f   :  { %v566_v14 = vmul.f32 0.35355338, %v559_v13  ;;  %v2420_v15 = vpop.f32.mrb[17].mxu1 }
 0x660   :  { %v562_v17 = vpop.f32.mrb[18].mxu1 }
 0x661   :  { %v567_v18 = vmul.f32 0.35355338, %v562_v17  ;;  %v2421_v19 = vpop.f32.mrb[19].mxu1  ;;  %v568_v21 = vadd.f32 %v566_v14, %v2985_v16 }
 0x663   :  { %v570_v22 = vsel %vm319_vm6, %v568_v21, -inf  ;;  %v569_v23 = vadd.f32 %v567_v18, %v2990_v20 }
 0x664   :  { %571 = vmax.xlane.f32.xlu0 %v570_v22 }
 0x665   :  { %v573_v24 = vsel %vm319_vm6, %v569_v23, -inf }
 0x666   :  { %574 = vmax.xlane.f32.xlu1 %v573_v24  ;;  %v684_v26 = vpop.f32.mrb[20].mxu1 }
 0x667   :  { %v691_v28 = vmul.f32 0.35355338, %v684_v26  ;;  %v2432_v29 = vpop.f32.mrb[21].mxu1 }
 0x668   :  { %v687_v30 = vpop.f32.mrb[22].mxu1 }
 0x669   :  { %v692_v31 = vmul.f32 0.35355338, %v687_v30  ;;  %v2433_v32 = vpop.f32.mrb[23].mxu1  ;;  %v693_v33 = vadd.f32 %v691_v28, %v2985_v16 }
 0x66b   :  { %v695_v34 = vsel %vm319_vm6, %v693_v33, -inf  ;;  %v694_v35 = vadd.f32 %v692_v31, %v2990_v20 }
 0x66c   :  { %696 = vmax.xlane.f32.xlu0 %v695_v34 }
 0x66d   :  { %v698_v36 = vsel %vm319_vm6, %v694_v35, -inf }
 0x66e   :  { %699 = vmax.xlane.f32.xlu1 %v698_v36 }
 0x6e9   :  { %v447_v37 = vpop.xlane.xlu1 %446 }
 0x6ea   :  { %v451_v38 = vsub.f32 %v443_v7, %v447_v37 }
 0x6eb   :  { %v450_v39 = vpop.xlane.xlu0 %449 }
 0x6ec   :  { %v453_v40 = vmul.f32 1.442695, %v451_v38  ;;  %v452_v41 = vsub.f32 %v444_v9, %v450_v39 }
 0x6ee   :  { %2684 = vpow2.f32 %v453_v40  ;;  %v455_v42 = vmul.f32 1.442695, %v452_v41 }
 0x6f0   :  { %2686 = vpow2.f32 %v455_v42  ;;  %v2644_v42 = vld [vmem:[%s3446_s5] sm:$0xff]  }
 0x6f1   :  { %v572_v43 = vpop.xlane.xlu0 %571  ;;  %2441 = vmatpush3.bf16.msra.mxu1 %v2644_v42 }
 0x6f2   :  { %v576_v44 = vsub.f32 %v568_v21, %v572_v43  ;;  %2442 = vmatprep.subr.bf16.mxu1 %v2799_v11 }
 0x6f3   :  { %v575_v45 = vpop.xlane.xlu1 %574 }
 0x6f4   :  { %v578_v46 = vmul.f32 1.442695, %v576_v44  ;;  %v577_v47 = vsub.f32 %v569_v23, %v575_v45 }
 0x6f6   :  { %2688 = vpow2.f32 %v578_v46  ;;  %v580_v48 = vmul.f32 1.442695, %v577_v47 }
 0x6f8   :  { %v2685_v49 = vpop.eup %2684  ;;  %2690 = vpow2.f32 %v580_v48 }
 0x6f9   :  { %v697_v53 = vpop.xlane.xlu0 %696  ;;  %v457_v55 = vsel %vm319_vm6, %v2685_v49, 0.0 }
 0x6fa   :  { %v2687_v56 = vpop.eup %2686  ;;  %v701_v57 = vsub.f32 %v693_v33, %v697_v53  ;;  %458 = vadd.xlane.f32.xlu0 %v457_v55  ;;  %v2645_v53 = vld [vmem:[%s3446_s5 + $0x8] sm:$0xff]  }
 0x6fb   :  { %v460_v58 = vsel %vm319_vm6, %v2687_v56, 0.0  ;;  %v700_v5 = vpop.xlane.xlu1 %699  ;;  %2443 = vmatpush3.bf16.msra.mxu1 %v2645_v53 }
 0x6fc   :  { %v703_v59 = vmul.f32 1.442695, %v701_v57  ;;  %461 = vadd.xlane.f32.xlu1 %v460_v58  ;;  %v702_v6 = vsub.f32 %v694_v35, %v700_v5  ;;  %2456 = vmatprep.subr.bf16.mxu1 %v2799_v11 }
 0x6fe   :  { %2692 = vpow2.f32 %v703_v59  ;;  %v705_v7 = vmul.f32 1.442695, %v702_v6 }
 0x700   :  { %v2689_v61 = vpop.eup %2688  ;;  %2694 = vpow2.f32 %v705_v7 }
 0x701   :  { %v582_v63 = vsel %vm319_vm6, %v2689_v61, 0.0 }
 0x702   :  { %v2691_v0 = vpop.eup %2690  ;;  %583 = vadd.xlane.f32.xlu0 %v582_v63 }
 0x703   :  { %v585_v1 = vsel %vm319_vm6, %v2691_v0, 0.0 }
 0x704   :  { %586 = vadd.xlane.f32.xlu1 %v585_v1 }
 0x708   :  { %v2693_v2 = vpop.eup %2692 }
 0x709   :  { %v707_v4 = vsel %vm319_vm6, %v2693_v2, 0.0 }
 0x70a   :  { %708 = vadd.xlane.f32.xlu0 %v707_v4  ;;  %v2695_v8 = vpop.eup %2694 }
 0x70b   :  { %v710_v9 = vsel %vm319_vm6, %v2695_v8, 0.0 }
 0x715   :  { %593 = vrot.lane.b32.xlu1 %v2972_v12, %s2809_s22 }
 0x720   :  { %468 = vrot.lane.b32.xlu0 %v2972_v12, %s2810_s23 }
 0x739   :  { %711 = vadd.xlane.f32.xlu1 %v710_v9 }
 0x74a   :  { %718 = vrot.lane.b32.xlu1 %v2972_v12, %s2811_s24 }
 0x787   :  { %v459_v13 = vpop.xlane.xlu0 %458 }
 0x789   :  { %v462_v10 = vpop.xlane.xlu1 %461 }
 0x78a   :  { %2696 = vrcp.f32 %v462_v10 }
 0x78b   :  { %2698 = vrcp.f32 %v459_v13 }
 0x78f   :  { %v584_v15 = vpop.xlane.xlu0 %583 }
 0x791   :  { %v587_v14 = vpop.xlane.xlu1 %586 }
 0x792   :  { %2700 = vrcp.f32 %v587_v14 }
 0x793   :  { %2702 = vrcp.f32 %v584_v15 }
 0x794   :  { %v2697_v17 = vpop.eup %2696 }
 0x795   :  { %v2699_v19 = vpop.eup %2698  ;;  %v466_v21 = vmul.f32 %v2697_v17, %v2687_v56  ;;  %v594_v12 = vpop.permute.xlu1 %593 }
 0x796   :  { %v465_v22 = vmul.f32 %v2699_v19, %v2685_v49 }
 0x797   :  { %v709_v18 = vpop.xlane.xlu0 %708 }
 0x798   :  { %v467_v24 = vpack.c.bf16 %v466_v21, %v465_v22  ;;  %2704 = vrcp.f32 %v709_v18 }
 0x79b   :  { %v469_v23 = vpop.permute.xlu0 %468 }
 0x79c   :  { %2411 = vmatpush3.bf16.msra.mxu0 %v469_v23  ;;  %v2701_v26 = vpop.eup %2700 }
 0x79d   :  { %2422 = vmatprep.subr.bf16.mxu0 %v2799_v11  ;;  %v2703_v28 = vpop.eup %2702  ;;  %v591_v29 = vmul.f32 %v2701_v26, %v2691_v0 }
 0x79e   :  { %v590_v30 = vmul.f32 %v2703_v28, %v2689_v61 }
 0x79f   :  { %2413 = vmatmul.mubr.msk.bf16.vlgmr.msra.gmra.mrb[4].mxu0 %vm319_vm6, %v467_v24 }
 0x7a0   :  { %2423 = vmatpush3.bf16.msra.mxu0 %v594_v12  ;;  %2424 = vmatprep.mubr.msk.bf16.mxu0 %vm2800_vm4, %v2799_v11  ;;  %v592_v31 = vpack.c.bf16 %v591_v29, %v590_v30 }
 0x7a1   :  { %2434 = vmatprep.subr.bf16.mxu0 %v2799_v11 }
 0x7a2   :  { %v2705_v34 = vpop.eup %2704 }
 0x7a3   :  { %v715_v36 = vmul.f32 %v2705_v34, %v2693_v2 }
 0x7a7   :  { %2425 = vmatmul.mubr.msk.bf16.vlgmr.msra.gmra.mrb[8].mxu0 %vm319_vm6, %v592_v31 }
 0x7a8   :  { %2436 = vmatprep.mubr.msk.bf16.mxu0 %vm2800_vm4, %v2799_v11 }
 0x7c6   :  { %v712_v32 = vpop.xlane.xlu1 %711 }
 0x7c7   :  { %2706 = vrcp.f32 %v712_v32  ;;  %v2646_v32 = vld [vmem:[%s3447_s6] sm:$0xff]  }
 0x7ca   :  { %v719_v33 = vpop.permute.xlu1 %718 }
 0x7cb   :  { %2435 = vmatpush3.bf16.msra.mxu0 %v719_v33  ;;  %v2647_v33 = vld [vmem:[%s3447_s6 + $0x8] sm:$0xff]  }
 0x7cc   :  { %2448 = vmatprep.subr.bf16.mxu0 %v2799_v11 }
 0x7d1   :  { %v2707_v35 = vpop.eup %2706 }
 0x7d2   :  { %v716_v37 = vmul.f32 %v2707_v35, %v2695_v8 }
 0x7d4   :  { %v717_v38 = vpack.c.bf16 %v716_v37, %v715_v36 }
 0x7d6   :  { %2437 = vmatmul.mubr.msk.bf16.vlgmr.msra.gmra.mrb[12].mxu0 %vm319_vm6, %v717_v38 }
 0x7d7   :  { %2452 = vmatprep.mubr.msk.bf16.mxu0 %vm2800_vm4, %v2799_v11  ;;  %2449 = vmatpush3.bf16.msra.mxu0 %v2646_v32 }
 0x7d8   :  { %2450 = vmatprep.subr.bf16.mxu0 %v2799_v11 }
 0x7db   :  { %2451 = vmatpush3.bf16.msra.mxu0 %v2647_v33 }
 0x7dc   :  { %2476 = vmatprep.subr.bf16.mxu0 %v2799_v11 }
 0x872   :  { %v508_v39 = vpop.f32.mrb[4].mxu0 }
 0x873   :  { %v2414_v40 = vpop.f32.mrb[5].mxu0 }
 0x874   :  { %v511_v41 = vpop.f32.mrb[6].mxu0 }
 0x875   :  { %v2612_v43 = vpack.i.bf16 %v511_v41, %v508_v39  ;;  %v2415_v44 = vpop.f32.mrb[7].mxu0 }
 0x877   :  { %2613 = vrot.lane.b32.xlu0 %v2612_v43, %s2812_s26 }
 0x87a   :  { %v633_v45 = vpop.f32.mrb[8].mxu0 }
 0x87b   :  { %v2426_v46 = vpop.f32.mrb[9].mxu0 }
 0x87c   :  { %v636_v47 = vpop.f32.mrb[10].mxu0 }
 0x87d   :  { %v2617_v48 = vpack.i.bf16 %v636_v47, %v633_v45  ;;  %v2427_v49 = vpop.f32.mrb[11].mxu0 }
 0x87f   :  { %2618 = vrot.lane.b32.xlu1 %v2617_v48, %s2813_s27  ;;  %v895_v48 = vsub.s32 2, %v2948_v50 }
 0x881   :  { %v896_v53 = vrot.slane %v2954_v52, %v895_v48 }
 0x8a9   :  { %v758_v55 = vpop.f32.mrb[12].mxu0 }
 0x8aa   :  { %v2438_v56 = vpop.f32.mrb[13].mxu0 }
 0x8ab   :  { %v761_v57 = vpop.f32.mrb[14].mxu0 }
 0x8ac   :  { %v2622_v58 = vpack.i.bf16 %v761_v57, %v758_v55  ;;  %v2439_v59 = vpop.f32.mrb[15].mxu0  ;;  %v901_v55 = vsub.s32 3, %v2948_v50 }
 0x8ae   :  { %2623 = vrot.lane.b32.xlu0 %v2622_v58, %s2814_s13 }
 0x8e9   :  { %v2614_v61 = vpop.permute.xlu0 %2613 }
 0x8ea   :  { %v2616_v0 = vunpack.i.h.bf16 %v2614_v61  ;;  %v2615_v1 = vunpack.i.l.bf16 %v2614_v61 }
 0x8ec   :  { %v790_v6 = vsel %vm267_vm5, %v3033_v62, %v2616_v0  ;;  %v789_v7 = vsel %vm267_vm5, %v3031_v60, %v2615_v1  ;;  %v803_v62 = vsub.s32 5, %v2948_v50  ;;  %v902_v0 = vrot.slane %v2954_v52, %v901_v55 }
 0x8ee   :  { %v804_v60 = vrot.slane %v2954_v52, %v803_v62 }
 0x8f1   :  { %v2619_v63 = vpop.permute.xlu1 %2618 }
 0x8f2   :  { %v2621_v2 = vunpack.i.h.bf16 %v2619_v63  ;;  %v2620_v4 = vunpack.i.l.bf16 %v2619_v63 }
 0x8f4   :  { %v792_v10 = vsel %vm319_vm6, %v790_v6, %v2621_v2  ;;  %v791_v13 = vsel %vm319_vm6, %v789_v7, %v2620_v4  ;;  %v2648_v6 = vld [vmem:[%s3448_s7] sm:$0xff]   ;;  %v2649_v7 = vld [vmem:[%s3448_s7 + $0x8] sm:$0xff]  }
 0x920   :  { %v2624_v5 = vpop.permute.xlu0 %2623 }
 0x921   :  { %v2626_v8 = vunpack.i.h.bf16 %v2624_v5  ;;  %v2625_v9 = vunpack.i.l.bf16 %v2624_v5 }
 0x923   :  { %v794_v14 = vsel %vm793_vm7, %v791_v13, %v2625_v9  ;;  %v795_v15 = vsel %vm793_vm7, %v792_v10, %v2626_v8  ;;  %v2650_v8 = vld [vmem:[%s3448_s7 + $0x10] sm:$0xff]   ;;  %v2651_v9 = vld [vmem:[%s3448_s7 + $0x18] sm:$0xff]   ;;  %v2652_v10 = vld [vmem:[%s3448_s7 + $0x20] sm:$0xff]  }
 0x924   :  { %v796_v17 = vpack.c.bf16 %v795_v15, %v794_v14  ;;  %v2653_v13 = vld [vmem:[%s3448_s7 + $0x28] sm:$0xff]   ;;  %v2654_v14 = vld [vmem:[%s3448_s7 + $0x30] sm:$0xff]   ;;  %v2655_v15 = vld [vmem:[%s3448_s7 + $0x38] sm:$0xff]  }
 0x926   :  { %2445 = vmatmul.mubr.msk.bf16.vlgmr.msra.gmra.mrb[24].mxu1 %vm154_vm3, %v796_v17  ;;  %v912_v17 = vsub.s32 6, %v2948_v50 }
 0x927   :  { %2472 = vmatprep.mubr.msk.bf16.mxu1 %vm2800_vm4, %v2799_v11  ;;  %2457 = vmatpush3.bf16.msra.mxu1 %v2648_v6 }
 0x928   :  { %2458 = vmatprep.subr.bf16.mxu1 %v2799_v11 }
 0x92b   :  { %2459 = vmatpush3.bf16.msra.mxu1 %v2649_v7 }
 0x92c   :  { %2460 = vmatprep.subr.bf16.mxu1 %v2799_v11 }
 0x92f   :  { %2461 = vmatpush3.bf16.msra.mxu1 %v2650_v8 }
 0x930   :  { %2462 = vmatprep.subr.bf16.mxu1 %v2799_v11 }
 0x933   :  { %2463 = vmatpush3.bf16.msra.mxu1 %v2651_v9 }
 0x934   :  { %2464 = vmatprep.subr.bf16.mxu1 %v2799_v11 }
 0x937   :  { %2465 = vmatpush3.bf16.msra.mxu1 %v2652_v10 }
 0x938   :  { %2466 = vmatprep.subr.bf16.mxu1 %v2799_v11 }
 0x93b   :  { %2467 = vmatpush3.bf16.msra.mxu1 %v2653_v13 }
 0x93c   :  { %2468 = vmatprep.subr.bf16.mxu1 %v2799_v11 }
 0x93f   :  { %2469 = vmatpush3.bf16.msra.mxu1 %v2654_v14 }
 0x940   :  { %2470 = vmatprep.subr.bf16.mxu1 %v2799_v11 }
 0x943   :  { %2471 = vmatpush3.bf16.msra.mxu1 %v2655_v15 }
 0x944   :  { %2502 = vmatprep.subr.bf16.mxu1 %v2799_v11 }
 0x9f9   :  { %v854_v18 = vpop.f32.mrb[24].mxu1 }
 0x9fa   :  { %v855_v19 = vadd.f32 %v854_v18, %v804_v60  ;;  %v2446_v21 = vpop.f32.mrb[25].mxu1 }
 0x9fb   :  { %v857_v22 = vpop.f32.mrb[26].mxu1 }
 0x9fc   :  { %v3098_v23 = vadd.f32 %v855_v19, %v2924_v27  ;;  %v858_v24 = vadd.f32 %v857_v22, %v804_v60  ;;  %v2447_v26 = vpop.f32.mrb[27].mxu1  ;;  %v913_v60 = vrot.slane %v2954_v52, %v912_v17 }
 0x9fe   :  { %v3101_v12 = vadd.f32 %v858_v24, %v2922_v25  ;;  %v863_v28 = vsel %vm154_vm3, %v3098_v23, 0.0  ;;  %v871_v31 = vmul.f32 %v3098_v23, %v3098_v23 }
 0x9ff   :  { %864 = vadd.xlane.f32.xlu1 %v863_v28 }
 0xa00   :  { %v866_v29 = vsel %vm154_vm3, %v3101_v12, 0.0  ;;  %v872_v30 = vmul.f32 %v3101_v12, %v3101_v12  ;;  %v873_v25 = vsel %vm154_vm3, %v871_v31, 0.0 }
 0xa01   :  { %867 = vadd.xlane.f32.xlu0 %v866_v29 }
 0xa02   :  { %v876_v27 = vsel %vm154_vm3, %v872_v30, 0.0 }
 0xa03   :  { %877 = vadd.xlane.f32.xlu1 %v876_v27 }
 0xa05   :  { %874 = vadd.xlane.f32.xlu0 %v873_v25 }
 0xa8c   :  { %v865_v34 = vpop.xlane.xlu1 %864 }
 0xa8d   :  { %v869_v36 = vmul.f32 0.03125, %v865_v34 }
 0xa8e   :  { %v868_v35 = vpop.xlane.xlu0 %867 }
 0xa8f   :  { %v870_v37 = vmul.f32 0.03125, %v868_v35  ;;  %v881_v42 = vmul.f32 %v869_v36, %v869_v36  ;;  %v885_v57 = vsub.f32 %v3098_v23, %v869_v36 }
 0xa90   :  { %v878_v38 = vpop.xlane.xlu1 %877 }
 0xa91   :  { %v882_v39 = vmul.f32 %v870_v37, %v870_v37  ;;  %v880_v40 = vmul.f32 0.03125, %v878_v38  ;;  %v886_v49 = vsub.f32 %v3101_v12, %v870_v37 }
 0xa92   :  { %v875_v41 = vpop.xlane.xlu0 %874 }
 0xa93   :  { %v884_v43 = vsub.f32 %v880_v40, %v882_v39  ;;  %v879_v44 = vmul.f32 0.03125, %v875_v41 }
 0xa95   :  { %v888_v45 = vadd.f32 1e-05, %v884_v43  ;;  %v883_v46 = vsub.f32 %v879_v44, %v881_v42 }
 0xa97   :  { %2708 = vrsqrt.f32 %v888_v45  ;;  %v887_v47 = vadd.f32 1e-05, %v883_v46  ;;  %v1007_v45 = vsub.s32 7, %v2948_v50 }
 0xa99   :  { %2710 = vrsqrt.f32 %v887_v47  ;;  %v1008_v46 = vrot.slane %v2954_v52, %v1007_v45 }
 0xaa1   :  { %v2709_v56 = vpop.eup %2708 }
 0xaa2   :  { %v892_v58 = vmul.f32 %v2709_v56, %v886_v49 }
 0xaa3   :  { %v2711_v59 = vpop.eup %2710 }
 0xaa4   :  { %v891_v61 = vmul.f32 %v2711_v59, %v885_v57  ;;  %v898_v63 = vmul.f32 %v896_v53, %v892_v58 }
 0xaa6   :  { %v897_v1 = vmul.f32 %v896_v53, %v891_v61  ;;  %v904_v4 = vadd.f32 %v902_v0, %v898_v63 }
 0xaa8   :  { %v903_v2 = vadd.f32 %v902_v0, %v897_v1 }
 0xaaa   :  { %v905_v5 = vpack.c.bf16 %v904_v4, %v903_v2  ;;  %v2656_v2 = vld [vmem:[%s3445_s4 + $0x10] sm:$0xff]   ;;  %v2657_v4 = vld [vmem:[%s3445_s4 + $0x18] sm:$0xff]  }
 0xaac   :  { %2453 = vmatmul.mubr.msk.bf16.vlgmr.msra.gmra.mrb[16].mxu0 %vm154_vm3, %v905_v5 }
 0xaad   :  { %2480 = vmatprep.mubr.msk.bf16.mxu0 %vm2800_vm4, %v2799_v11  ;;  %2477 = vmatpush3.bf16.msra.mxu0 %v2656_v2 }
 0xaae   :  { %2478 = vmatprep.subr.bf16.mxu0 %v2799_v11 }
 0xab1   :  { %2479 = vmatpush3.bf16.msra.mxu0 %v2657_v4 }
 0xab2   :  { %2484 = vmatprep.subr.bf16.mxu0 %v2799_v11 }
 0xb7f   :  { %v963_v18 = vpop.f32.mrb[16].mxu0 }
 0xb80   :  { %v964_v19 = vadd.f32 %v963_v18, %v913_v60  ;;  %v2454_v21 = vpop.f32.mrb[17].mxu0 }
 0xb81   :  { %v966_v22 = vpop.f32.mrb[18].mxu0 }
 0xb82   :  { %v970_v24 = vmul.f32 %v964_v19, %v964_v19  ;;  %v967_v26 = vadd.f32 %v966_v22, %v913_v60  ;;  %v2455_v28 = vpop.f32.mrb[19].mxu0 }
 0xb84   :  { %v972_v29 = vmul.f32 %v970_v24, %v964_v19  ;;  %v971_v30 = vmul.f32 %v967_v26, %v967_v26  ;;  %v3203_v24 = vld [vmem:[%s3449_s8 + $0x8] sm:$0xff] }
 0xb86   :  { %v974_v31 = vmul.f32 0.044715, %v972_v29  ;;  %v973_v27 = vmul.f32 %v971_v30, %v967_v26  ;;  %v1141_v30 = vrot.slane %v3203_v24, %v194_v54 }
 0xb88   :  { %v976_v25 = vadd.f32 %v974_v31, %v964_v19  ;;  %v975_v32 = vmul.f32 0.044715, %v973_v27 }
 0xb8a   :  { %v978_v33 = vmul.f32 0.7978846, %v976_v25  ;;  %v977_v34 = vadd.f32 %v975_v32, %v967_v26 }
 0xb8c   :  { %2712 = vtanh.f32 %v978_v33  ;;  %v979_v35 = vmul.f32 0.7978846, %v977_v34 }
 0xb8e   :  { %2714 = vtanh.f32 %v979_v35 }
 0xb96   :  { %v2713_v36 = vpop.eup %2712 }
 0xb97   :  { %v982_v37 = vadd.f32 1.0, %v2713_v36 }
 0xb98   :  { %v2715_v38 = vpop.eup %2714 }
 0xb99   :  { %v984_v39 = vmul.f32 0.5, %v982_v37  ;;  %v983_v40 = vadd.f32 1.0, %v2715_v38 }
 0xb9b   :  { %v985_v41 = vmul.f32 0.5, %v983_v40  ;;  %v986_v42 = vmul.f32 %v984_v39, %v964_v19 }
 0xb9d   :  { %v987_v43 = vmul.f32 %v985_v41, %v967_v26  ;;  %v1135_v26 = vrot.slane %v3203_v24, %v188_v51  ;;  %v1153_v51 = vrot.slane %v3203_v24, %v205_v3 }
 0xb9f   :  { %v988_v44 = vpack.c.bf16 %v987_v43, %v986_v42 }
 0xba1   :  { %2473 = vmatmul.mubr.bf16.vlgmr.msra.gmra.mrb[28].mxu1 %v988_v44 }
 0xba2   :  { %2504 = vmatprep.mubr.msk.bf16.mxu1 %vm2800_vm4, %v2799_v11 }
 0xc74   :  { %v1091_v47 = vpop.f32.mrb[28].mxu1 }
 0xc75   :  { %v1092_v49 = vadd.f32 %v1091_v47, %v1008_v46  ;;  %v2474_v53 = vpop.f32.mrb[29].mxu1 }
 0xc76   :  { %v1094_v56 = vpop.f32.mrb[30].mxu1 }
 0xc77   :  { %v3177_v57 = vadd.f32 %v1092_v49, %v3098_v23  ;;  %v1095_v58 = vadd.f32 %v1094_v56, %v1008_v46  ;;  %v2475_v59 = vpop.f32.mrb[31].mxu1 }
 0xc79   :  { %v3180_v61 = vadd.f32 %v1095_v58, %v3101_v12  ;;  %v1102_v63 = vsel %vm154_vm3, %v3177_v57, 0.0  ;;  %v1110_v0 = vmul.f32 %v3177_v57, %v3177_v57 }
 0xc7a   :  { %1103 = vadd.xlane.f32.xlu0 %v1102_v63 }
 0xc7b   :  { %v1105_v52 = vsel %vm154_vm3, %v3180_v61, 0.0  ;;  %v1111_v1 = vmul.f32 %v3180_v61, %v3180_v61  ;;  %v1112_v23 = vsel %vm154_vm3, %v1110_v0, 0.0 }
 0xc7c   :  { %1106 = vadd.xlane.f32.xlu1 %v1105_v52 }
 0xc7d   :  { %v1115_v12 = vsel %vm154_vm3, %v1111_v1, 0.0 }
 0xc7e   :  { %1113 = vadd.xlane.f32.xlu0 %v1112_v23 }
 0xc80   :  { %1116 = vadd.xlane.f32.xlu1 %v1115_v12 }
 0xd07   :  { %v1104_v5 = vpop.xlane.xlu0 %1103 }
 0xd08   :  { %v1108_v6 = vmul.f32 0.03125, %v1104_v5 }
 0xd09   :  { %v1107_v7 = vpop.xlane.xlu1 %1106 }
 0xd0a   :  { %v1109_v8 = vmul.f32 0.03125, %v1107_v7  ;;  %v1120_v10 = vmul.f32 %v1108_v6, %v1108_v6  ;;  %v1124_v28 = vsub.f32 %v3177_v57, %v1108_v6 }
 0xd0b   :  { %v1114_v9 = vpop.xlane.xlu0 %1113 }
 0xd0c   :  { %v1118_v13 = vmul.f32 0.03125, %v1114_v9  ;;  %v1121_v15 = vmul.f32 %v1109_v8, %v1109_v8  ;;  %v1125_v31 = vsub.f32 %v3180_v61, %v1109_v8 }
 0xd0d   :  { %v1117_v14 = vpop.xlane.xlu1 %1116 }
 0xd0e   :  { %v1122_v60 = vsub.f32 %v1118_v13, %v1120_v10  ;;  %v1119_v18 = vmul.f32 0.03125, %v1117_v14 }
 0xd10   :  { %v1126_v19 = vadd.f32 1e-05, %v1122_v60  ;;  %v1123_v21 = vsub.f32 %v1119_v18, %v1121_v15 }
 0xd12   :  { %2716 = vrsqrt.f32 %v1126_v19  ;;  %v1127_v22 = vadd.f32 1e-05, %v1123_v21 }
 0xd14   :  { %2718 = vrsqrt.f32 %v1127_v22 }
 0xd1c   :  { %v2717_v29 = vpop.eup %2716 }
 0xd1d   :  { %v1130_v27 = vmul.f32 %v2717_v29, %v1124_v28 }
 0xd1e   :  { %v2719_v25 = vpop.eup %2718 }
 0xd1f   :  { %v1131_v32 = vmul.f32 %v2719_v25, %v1125_v31  ;;  %v1136_v33 = vmul.f32 %v1135_v26, %v1130_v27 }
 0xd21   :  { %v1137_v34 = vmul.f32 %v1135_v26, %v1131_v32  ;;  %v1142_v35 = vadd.f32 %v1141_v30, %v1136_v33 }
 0xd23   :  { %v1143_v36 = vadd.f32 %v1141_v30, %v1137_v34 }
 0xd25   :  { %v1144_v37 = vpack.c.bf16 %v1143_v36, %v1142_v35 }
 0xd27   :  { %2481 = vmatmul.mubr.msk.bf16.vlgmr.msra.gmra.mrb[20].mxu0 %vm154_vm3, %v1144_v37 }
 0xd28   :  { %2486 = vmatprep.mubr.msk.bf16.mxu0 %vm2800_vm4, %v2799_v11 }
 0xdfa   :  { %v1203_v54 = vpop.f32.mrb[20].mxu0 }
 0xdfb   :  { %v2482_v38 = vpop.f32.mrb[21].mxu0  ;;  %v1204_v40 = vadd.f32 %v1203_v54, %v1153_v51 }
 0xdfc   :  { %v1206_v39 = vpop.f32.mrb[22].mxu0 }
 0xdfd   :  { %v1207_v41 = vadd.f32 %v1206_v39, %v1153_v51  ;;  %v2483_v42 = vpop.f32.mrb[23].mxu0  ;;  %v2772_v39 = vld [vmem:[%s3444_s3] sm:$0xff] }
 0xdfe   :  { %v2773_v42 = vld [vmem:[%s3444_s3 + $0x8] sm:$0xff] }
 0xdff   :  { %v3219_v43 = vpack.c.bf16 %v1207_v41, %v1204_v40 }
 0xe01   :  { %1212 = vrot.lane.b32.xlu0 %v3219_v43, %s2801_s30 }
 0xe05   :  { %1337 = vrot.lane.b32.xlu0 %v3219_v43, %s2802_s17 }
 0xe09   :  { %1335 = vrot.lane.b32.xlu0 %v3219_v43, %s2805_s20 }
 0xe0d   :  { %1462 = vrot.lane.b32.xlu0 %v3219_v43, %s2806_s0 }
 0xe11   :  { %1460 = vrot.lane.b32.xlu0 %v3219_v43, %s2807_s21 }
 0xe15   :  { %1585 = vrot.lane.b32.xlu0 %v3219_v43, %s2808_s1 }
 0xe73   :  { %v1213_v3 = vpop.permute.xlu0 %1212 }
 0xe74   :  { %v1218_v44 = vsel %vm267_vm5, %v1213_v3, 0 }
 0xe75   :  { %2485 = vmatpush3.bf16.xpose.msra.mxu0 %v1218_v44 }
 0xe76   :  { %2490 = vmatprep.subr.bf16.mxu0 %v2799_v11 }
 0xe77   :  { %v1338_v14 = vpop.permute.xlu0 %1337 }
 0xe78   :  { %v1343_v22 = vsel %vm267_vm5, %v1338_v14, 0 }
 0xe7b   :  { %v1336_v21 = vpop.permute.xlu0 %1335 }
 0xe7c   :  { %2487 = vmatmul.mubr.msk.bf16.vlgmr.msra.gmra.mrb[24].mxu0 %vm267_vm5, %v3219_v43 }
 0xe7d   :  { %2492 = vmatprep.mubr.msk.bf16.mxu0 %vm2800_vm4, %v2799_v11 }
 0xe7f   :  { %v1463_v26 = vpop.permute.xlu0 %1462 }
 0xe80   :  { %v1468_v28 = vsel %vm267_vm5, %v1463_v26, 0 }
 0xe83   :  { %v1461_v30 = vpop.permute.xlu0 %1460 }
 0xe87   :  { %v1586_v27 = vpop.permute.xlu0 %1585 }
 0xf4f   :  { %v1254_v46 = vpop.f32.mrb[24].mxu0 }
 0xf50   :  { %v1261_v47 = vmul.f32 0.35355338, %v1254_v46  ;;  %v2488_v49 = vpop.f32.mrb[25].mxu0 }
 0xf51   :  { %v1257_v53 = vpop.f32.mrb[26].mxu0 }
 0xf52   :  { %v1262_v56 = vmul.f32 0.35355338, %v1257_v53  ;;  %v2489_v58 = vpop.f32.mrb[27].mxu0  ;;  %v1263_v59 = vadd.f32 %v1261_v47, %v2985_v16 }
 0xf54   :  { %v1265_v63 = vsel %vm319_vm6, %v1263_v59, -inf  ;;  %v1264_v0 = vadd.f32 %v1262_v56, %v2990_v20 }
 0xf55   :  { %1266 = vmax.xlane.f32.xlu1 %v1265_v63 }
 0xf56   :  { %v1268_v52 = vsel %vm319_vm6, %v1264_v0, -inf }
 0xf59   :  { %1269 = vmax.xlane.f32.xlu1 %v1268_v52 }
 0xfe2   :  { %v1267_v1 = vpop.xlane.xlu1 %1266 }
 0xfe3   :  { %v1271_v23 = vsub.f32 %v1263_v59, %v1267_v1 }
 0xfe5   :  { %v1273_v12 = vmul.f32 1.442695, %v1271_v23 }
 0xfe6   :  { %v1270_v2 = vpop.xlane.xlu1 %1269 }
 0xfe7   :  { %2720 = vpow2.f32 %v1273_v12  ;;  %v1272_v4 = vsub.f32 %v1264_v0, %v1270_v2 }
 0xfe9   :  { %v1275_v5 = vmul.f32 1.442695, %v1272_v4 }
 0xfeb   :  { %2722 = vpow2.f32 %v1275_v5 }
 0xff1   :  { %v2721_v6 = vpop.eup %2720 }
 0xff2   :  { %v1277_v7 = vsel %vm319_vm6, %v2721_v6, 0.0 }
 0xff3   :  { %1278 = vadd.xlane.f32.xlu1 %v1277_v7 }
 0xff5   :  { %v2723_v16 = vpop.eup %2722 }
 0xff6   :  { %v1280_v8 = vsel %vm319_vm6, %v2723_v16, 0.0 }
 0xff7   :  { %1281 = vadd.xlane.f32.xlu1 %v1280_v8 }
0x1008   :  { %1288 = vrot.lane.b32.xlu1 %v3219_v43, %s2804_s19 }
0x100c   :  { %1587 = vrot.lane.b32.xlu1 %v3219_v43, %s2803_s18 }
0x1080   :  { %v1279_v20 = vpop.xlane.xlu1 %1278 }
0x1081   :  { %2724 = vrcp.f32 %v1279_v20 }
0x1084   :  { %v1282_v9 = vpop.xlane.xlu1 %1281 }
0x1085   :  { %2726 = vrcp.f32 %v1282_v9 }
0x1088   :  { %v1289_v10 = vpop.permute.xlu1 %1288 }
0x1089   :  { %2491 = vmatpush3.bf16.msra.mxu0 %v1289_v10 }
0x108a   :  { %2496 = vmatprep.subr.bf16.mxu0 %v2799_v11 }
0x108b   :  { %v2725_v13 = vpop.eup %2724 }
0x108c   :  { %v1285_v60 = vmul.f32 %v2725_v13, %v2721_v6  ;;  %v1588_v29 = vpop.permute.xlu1 %1587 }
0x108d   :  { %v1593_v31 = vsel %vm267_vm5, %v1588_v29, 0 }
0x108f   :  { %v2727_v15 = vpop.eup %2726 }
0x1090   :  { %v1286_v18 = vmul.f32 %v2727_v15, %v2723_v16 }
0x1092   :  { %v1287_v19 = vpack.c.bf16 %v1286_v18, %v1285_v60 }
0x1094   :  { %2493 = vmatmul.mubr.msk.bf16.vlgmr.msra.gmra.mrb[28].mxu0 %vm319_vm6, %v1287_v19 }
0x1095   :  { %2497 = vmatpush3.bf16.xpose.msra.mxu0 %v1343_v22  ;;  %2498 = vmatprep.mubr.msk.bf16.mxu0 %vm2800_vm4, %v2799_v11 }
0x1096   :  { %2508 = vmatprep.subr.bf16.mxu0 %v2799_v11 }
0x109c   :  { %2499 = vmatmul.mubr.msk.bf16.vlgmr.msra.gmra.mrb[32].mxu0 %vm267_vm5, %v1336_v21 }
0x109d   :  { %2509 = vmatpush3.bf16.xpose.msra.mxu0 %v1468_v28  ;;  %2510 = vmatprep.mubr.msk.bf16.mxu0 %vm2800_vm4, %v2799_v11 }
0x109e   :  { %2520 = vmatprep.subr.bf16.mxu0 %v2799_v11 }
0x10a4   :  { %2511 = vmatmul.mubr.msk.bf16.vlgmr.msra.gmra.mrb[36].mxu0 %vm267_vm5, %v1461_v30 }
0x10a5   :  { %2521 = vmatpush3.bf16.xpose.msra.mxu0 %v1593_v31  ;;  %2522 = vmatprep.mubr.msk.bf16.mxu0 %vm2800_vm4, %v2799_v11 }
0x10a6   :  { %2532 = vmatprep.subr.bf16.mxu0 %v2799_v11 }
0x10ac   :  { %2523 = vmatmul.mubr.msk.bf16.vlgmr.msra.gmra.mrb[40].mxu0 %vm267_vm5, %v1586_v27 }
0x10ad   :  { %2536 = vmatprep.mubr.msk.bf16.mxu0 %vm2800_vm4, %v2799_v11 }
0x1167   :  { %v3268_v25 = vpop.f32.mrb[28].mxu0 }
0x1168   :  { %v2494_v32 = vpop.f32.mrb[29].mxu0 }
0x1169   :  { %v3270_v33 = vpop.f32.mrb[30].mxu0 }
0x116a   :  { %v2495_v34 = vpop.f32.mrb[31].mxu0 }
0x116f   :  { %v1379_v35 = vpop.f32.mrb[32].mxu0 }
0x1170   :  { %v1386_v36 = vmul.f32 0.35355338, %v1379_v35  ;;  %v2500_v37 = vpop.f32.mrb[33].mxu0 }
0x1171   :  { %v1382_v51 = vpop.f32.mrb[34].mxu0 }
0x1172   :  { %v1387_v54 = vmul.f32 0.35355338, %v1382_v51  ;;  %v2501_v38 = vpop.f32.mrb[35].mxu0  ;;  %v1388_v40 = vadd.f32 %v2772_v39, %v1386_v36 }
0x1174   :  { %v1390_v41 = vsel %vm319_vm6, %v1388_v40, -inf  ;;  %v1389_v3 = vadd.f32 %v2773_v42, %v1387_v54 }
0x1175   :  { %1391 = vmax.xlane.f32.xlu1 %v1390_v41 }
0x1176   :  { %v1393_v44 = vsel %vm319_vm6, %v1389_v3, -inf }
0x1177   :  { %1394 = vmax.xlane.f32.xlu0 %v1393_v44  ;;  %v1504_v46 = vpop.f32.mrb[36].mxu0 }
0x1178   :  { %v1511_v47 = vmul.f32 0.35355338, %v1504_v46  ;;  %v2512_v49 = vpop.f32.mrb[37].mxu0 }
0x1179   :  { %v1507_v53 = vpop.f32.mrb[38].mxu0 }
0x117a   :  { %v1512_v56 = vmul.f32 0.35355338, %v1507_v53  ;;  %v2513_v58 = vpop.f32.mrb[39].mxu0  ;;  %v1513_v59 = vadd.f32 %v2772_v39, %v1511_v47 }
0x117c   :  { %v1515_v63 = vsel %vm319_vm6, %v1513_v59, -inf  ;;  %v1514_v0 = vadd.f32 %v2773_v42, %v1512_v56 }
0x117d   :  { %1516 = vmax.xlane.f32.xlu0 %v1515_v63 }
0x117e   :  { %v1518_v52 = vsel %vm319_vm6, %v1514_v0, -inf }
0x117f   :  { %1519 = vmax.xlane.f32.xlu1 %v1518_v52  ;;  %v1629_v1 = vpop.f32.mrb[40].mxu0 }
0x1180   :  { %v1636_v23 = vmul.f32 0.35355338, %v1629_v1  ;;  %v2524_v12 = vpop.f32.mrb[41].mxu0 }
0x1181   :  { %v1632_v2 = vpop.f32.mrb[42].mxu0 }
0x1182   :  { %v1637_v4 = vmul.f32 0.35355338, %v1632_v2  ;;  %v2525_v5 = vpop.f32.mrb[43].mxu0  ;;  %v1638_v6 = vadd.f32 %v2772_v39, %v1636_v23 }
0x1184   :  { %v1640_v7 = vsel %vm319_vm6, %v1638_v6, -inf  ;;  %v1639_v16 = vadd.f32 %v2773_v42, %v1637_v4 }
0x1185   :  { %1641 = vmax.xlane.f32.xlu0 %v1640_v7 }
0x1186   :  { %v1643_v8 = vsel %vm319_vm6, %v1639_v16, -inf }
0x1187   :  { %1644 = vmax.xlane.f32.xlu1 %v1643_v8 }
0x1202   :  { %v1392_v20 = vpop.xlane.xlu1 %1391 }
0x1203   :  { %v1396_v9 = vsub.f32 %v1388_v40, %v1392_v20 }
0x1204   :  { %v1395_v10 = vpop.xlane.xlu0 %1394 }
0x1205   :  { %v1398_v13 = vmul.f32 1.442695, %v1396_v9  ;;  %v1397_v14 = vsub.f32 %v1389_v3, %v1395_v10 }
0x1207   :  { %2728 = vpow2.f32 %v1398_v13  ;;  %v1400_v15 = vmul.f32 1.442695, %v1397_v14 }
0x1209   :  { %2730 = vpow2.f32 %v1400_v15  ;;  %v2658_v15 = vld [vmem:[%s3446_s5 + $0x10] sm:$0xff]  }
0x120a   :  { %v1517_v60 = vpop.xlane.xlu0 %1516  ;;  %2533 = vmatpush3.bf16.msra.mxu0 %v2658_v15 }
0x120b   :  { %v1521_v18 = vsub.f32 %v1513_v59, %v1517_v60  ;;  %2534 = vmatprep.subr.bf16.mxu0 %v2799_v11 }
0x120c   :  { %v1520_v19 = vpop.xlane.xlu1 %1519 }
0x120d   :  { %v1523_v21 = vmul.f32 1.442695, %v1521_v18  ;;  %v1522_v22 = vsub.f32 %v1514_v0, %v1520_v19 }
0x120f   :  { %2732 = vpow2.f32 %v1523_v21  ;;  %v1525_v26 = vmul.f32 1.442695, %v1522_v22 }
0x1211   :  { %v2729_v28 = vpop.eup %2728  ;;  %2734 = vpow2.f32 %v1525_v26 }
0x1212   :  { %v1642_v29 = vpop.xlane.xlu0 %1641  ;;  %v1402_v30 = vsel %vm319_vm6, %v2729_v28, 0.0 }
0x1213   :  { %v2731_v31 = vpop.eup %2730  ;;  %v1646_v27 = vsub.f32 %v1638_v6, %v1642_v29  ;;  %1403 = vadd.xlane.f32.xlu0 %v1402_v30  ;;  %v2659_v29 = vld [vmem:[%s3446_s5 + $0x18] sm:$0xff]  }
0x1214   :  { %v1405_v32 = vsel %vm319_vm6, %v2731_v31, 0.0  ;;  %v1645_v39 = vpop.xlane.xlu1 %1644  ;;  %2535 = vmatpush3.bf16.msra.mxu0 %v2659_v29 }
0x1215   :  { %v1648_v34 = vmul.f32 1.442695, %v1646_v27  ;;  %1406 = vadd.xlane.f32.xlu1 %v1405_v32  ;;  %v1647_v40 = vsub.f32 %v1639_v16, %v1645_v39  ;;  %2548 = vmatprep.subr.bf16.mxu0 %v2799_v11 }
0x1217   :  { %2736 = vpow2.f32 %v1648_v34  ;;  %v1650_v41 = vmul.f32 1.442695, %v1647_v40 }
0x1219   :  { %v2733_v35 = vpop.eup %2732  ;;  %2738 = vpow2.f32 %v1650_v41 }
0x121a   :  { %v1527_v36 = vsel %vm319_vm6, %v2733_v35, 0.0 }
0x121b   :  { %v2735_v37 = vpop.eup %2734  ;;  %1528 = vadd.xlane.f32.xlu0 %v1527_v36 }
0x121c   :  { %v1530_v51 = vsel %vm319_vm6, %v2735_v37, 0.0 }
0x121d   :  { %1531 = vadd.xlane.f32.xlu1 %v1530_v51 }
0x1221   :  { %v2737_v54 = vpop.eup %2736 }
0x1222   :  { %v1652_v38 = vsel %vm319_vm6, %v2737_v54, 0.0 }
0x1223   :  { %1653 = vadd.xlane.f32.xlu0 %v1652_v38  ;;  %v2739_v42 = vpop.eup %2738 }
0x1224   :  { %v1655_v3 = vsel %vm319_vm6, %v2739_v42, 0.0 }
0x122e   :  { %1538 = vrot.lane.b32.xlu1 %v3219_v43, %s2809_s22 }
0x1239   :  { %1413 = vrot.lane.b32.xlu0 %v3219_v43, %s2810_s23 }
0x1252   :  { %1656 = vadd.xlane.f32.xlu1 %v1655_v3 }
0x1263   :  { %1663 = vrot.lane.b32.xlu1 %v3219_v43, %s2811_s24 }
0x12a0   :  { %v1404_v46 = vpop.xlane.xlu0 %1403 }
0x12a2   :  { %v1407_v44 = vpop.xlane.xlu1 %1406 }
0x12a3   :  { %2740 = vrcp.f32 %v1407_v44 }
0x12a4   :  { %2742 = vrcp.f32 %v1404_v46 }
0x12a8   :  { %v1529_v49 = vpop.xlane.xlu0 %1528 }
0x12aa   :  { %v1532_v47 = vpop.xlane.xlu1 %1531 }
0x12ab   :  { %2744 = vrcp.f32 %v1532_v47 }
0x12ac   :  { %2746 = vrcp.f32 %v1529_v49 }
0x12ad   :  { %v2741_v53 = vpop.eup %2740 }
0x12ae   :  { %v2743_v58 = vpop.eup %2742  ;;  %v1411_v59 = vmul.f32 %v2741_v53, %v2731_v31  ;;  %v1539_v43 = vpop.permute.xlu1 %1538 }
0x12af   :  { %v1410_v63 = vmul.f32 %v2743_v58, %v2729_v28 }
0x12b0   :  { %v1654_v56 = vpop.xlane.xlu0 %1653 }
0x12b1   :  { %v1412_v52 = vpack.c.bf16 %v1411_v59, %v1410_v63  ;;  %2748 = vrcp.f32 %v1654_v56 }
0x12b4   :  { %v1414_v0 = vpop.permute.xlu0 %1413 }
0x12b5   :  { %2503 = vmatpush3.bf16.msra.mxu1 %v1414_v0  ;;  %v2745_v1 = vpop.eup %2744 }
0x12b6   :  { %2514 = vmatprep.subr.bf16.mxu1 %v2799_v11  ;;  %v2747_v23 = vpop.eup %2746  ;;  %v1536_v12 = vmul.f32 %v2745_v1, %v2735_v37 }
0x12b7   :  { %v1535_v2 = vmul.f32 %v2747_v23, %v2733_v35 }
0x12b8   :  { %2505 = vmatmul.mubr.msk.bf16.vlgmr.msra.gmra.mrb[32].mxu1 %vm319_vm6, %v1412_v52 }
0x12b9   :  { %2515 = vmatpush3.bf16.msra.mxu1 %v1539_v43  ;;  %2516 = vmatprep.mubr.msk.bf16.mxu1 %vm2800_vm4, %v2799_v11  ;;  %v1537_v4 = vpack.c.bf16 %v1536_v12, %v1535_v2  ;;  %v2660_v2 = vld [vmem:[%s3447_s6 + $0x10] sm:$0xff]  }
0x12ba   :  { %2526 = vmatprep.subr.bf16.mxu1 %v2799_v11 }
0x12bb   :  { %v2749_v7 = vpop.eup %2748 }
0x12bc   :  { %v1660_v8 = vmul.f32 %v2749_v7, %v2737_v54 }
0x12c0   :  { %2517 = vmatmul.mubr.msk.bf16.vlgmr.msra.gmra.mrb[36].mxu1 %vm319_vm6, %v1537_v4  ;;  %v2661_v4 = vld [vmem:[%s3447_s6 + $0x18] sm:$0xff]  }
0x12c1   :  { %2528 = vmatprep.mubr.msk.bf16.mxu1 %vm2800_vm4, %v2799_v11 }
0x12df   :  { %v1657_v5 = vpop.xlane.xlu1 %1656 }
0x12e0   :  { %2750 = vrcp.f32 %v1657_v5 }
0x12e3   :  { %v1664_v6 = vpop.permute.xlu1 %1663 }
0x12e4   :  { %2527 = vmatpush3.bf16.msra.mxu1 %v1664_v6 }
0x12e5   :  { %2540 = vmatprep.subr.bf16.mxu1 %v2799_v11 }
0x12ea   :  { %v2751_v16 = vpop.eup %2750 }
0x12eb   :  { %v1661_v20 = vmul.f32 %v2751_v16, %v2739_v42 }
0x12ed   :  { %v1662_v9 = vpack.c.bf16 %v1661_v20, %v1660_v8 }
0x12ef   :  { %2529 = vmatmul.mubr.msk.bf16.vlgmr.msra.gmra.mrb[40].mxu1 %vm319_vm6, %v1662_v9 }
0x12f0   :  { %2544 = vmatprep.mubr.msk.bf16.mxu1 %vm2800_vm4, %v2799_v11  ;;  %2541 = vmatpush3.bf16.msra.mxu1 %v2660_v2 }
0x12f1   :  { %2542 = vmatprep.subr.bf16.mxu1 %v2799_v11 }
0x12f4   :  { %2543 = vmatpush3.bf16.msra.mxu1 %v2661_v4 }
0x12f5   :  { %2568 = vmatprep.subr.bf16.mxu1 %v2799_v11 }
0x138b   :  { %v1453_v10 = vpop.f32.mrb[32].mxu1 }
0x138c   :  { %v2506_v13 = vpop.f32.mrb[33].mxu1 }
0x138d   :  { %v1456_v14 = vpop.f32.mrb[34].mxu1 }
0x138e   :  { %v2627_v60 = vpack.i.bf16 %v1456_v14, %v1453_v10  ;;  %v2507_v18 = vpop.f32.mrb[35].mxu1 }
0x1390   :  { %2628 = vrot.lane.b32.xlu0 %v2627_v60, %s2812_s26 }
0x1393   :  { %v1578_v19 = vpop.f32.mrb[36].mxu1 }
0x1394   :  { %v2518_v21 = vpop.f32.mrb[37].mxu1 }
0x1395   :  { %v1581_v22 = vpop.f32.mrb[38].mxu1 }
0x1396   :  { %v2632_v26 = vpack.i.bf16 %v1581_v22, %v1578_v19  ;;  %v2519_v28 = vpop.f32.mrb[39].mxu1  ;;  %v1841_v22 = vrot.slane %v3203_v24, %v895_v48  ;;  %v2662_v48 = vld [vmem:[%s3448_s7 + $0x40] sm:$0xff]  }
0x1398   :  { %2633 = vrot.lane.b32.xlu1 %v2632_v26, %s2813_s27 }
0x13c2   :  { %v1703_v30 = vpop.f32.mrb[40].mxu1 }
0x13c3   :  { %v2530_v31 = vpop.f32.mrb[41].mxu1 }
0x13c4   :  { %v1706_v27 = vpop.f32.mrb[42].mxu1 }
0x13c5   :  { %v2637_v32 = vpack.i.bf16 %v1706_v27, %v1703_v30  ;;  %v2531_v34 = vpop.f32.mrb[43].mxu1 }
0x13c7   :  { %2638 = vrot.lane.b32.xlu0 %v2637_v32, %s2814_s13  ;;  %v1847_v32 = vrot.slane %v3203_v24, %v901_v55  ;;  %v2663_v55 = vld [vmem:[%s3448_s7 + $0x48] sm:$0xff]  }
0x1402   :  { %v2629_v35 = vpop.permute.xlu0 %2628 }
0x1403   :  { %v2631_v37 = vunpack.i.h.bf16 %v2629_v35  ;;  %v2630_v51 = vunpack.i.l.bf16 %v2629_v35 }
0x1405   :  { %v1735_v40 = vsel %vm267_vm5, %v3270_v33, %v2631_v37  ;;  %v1734_v41 = vsel %vm267_vm5, %v3268_v25, %v2630_v51  ;;  %v1749_v25 = vrot.slane %v3203_v24, %v803_v62  ;;  %v2664_v51 = vld [vmem:[%s3448_s7 + $0x50] sm:$0xff]  }
0x140a   :  { %v2634_v36 = vpop.permute.xlu1 %2633 }
0x140b   :  { %v2636_v54 = vunpack.i.h.bf16 %v2634_v36  ;;  %v2635_v38 = vunpack.i.l.bf16 %v2634_v36 }
0x140d   :  { %v1737_v44 = vsel %vm319_vm6, %v1735_v40, %v2636_v54  ;;  %v1736_v46 = vsel %vm319_vm6, %v1734_v41, %v2635_v38  ;;  %v2665_v54 = vld [vmem:[%s3448_s7 + $0x58] sm:$0xff]   ;;  %v2666_v38 = vld [vmem:[%s3448_s7 + $0x60] sm:$0xff]   ;;  %v2668_v40 = vld [vmem:[%s3448_s7 + $0x70] sm:$0xff]  }
0x140e   :  { %v2669_v41 = vld [vmem:[%s3448_s7 + $0x78] sm:$0xff]  }
0x1439   :  { %v2639_v39 = vpop.permute.xlu0 %2638 }
0x143a   :  { %v2641_v42 = vunpack.i.h.bf16 %v2639_v39  ;;  %v2640_v3 = vunpack.i.l.bf16 %v2639_v39  ;;  %v2667_v39 = vld [vmem:[%s3448_s7 + $0x68] sm:$0xff]  }
0x143c   :  { %v1739_v47 = vsel %vm793_vm7, %v1737_v44, %v2641_v42  ;;  %v1738_v49 = vsel %vm793_vm7, %v1736_v46, %v2640_v3  ;;  %v1859_v42 = vrot.slane %v3203_v24, %v912_v17 }
0x143d   :  { %v1740_v53 = vpack.c.bf16 %v1739_v47, %v1738_v49 }
0x143f   :  { %2537 = vmatmul.mubr.msk.bf16.vlgmr.msra.gmra.mrb[44].mxu0 %vm154_vm3, %v1740_v53 }
0x1440   :  { %2564 = vmatprep.mubr.msk.bf16.mxu0 %vm2800_vm4, %v2799_v11  ;;  %2549 = vmatpush3.bf16.msra.mxu0 %v2662_v48 }
0x1441   :  { %2550 = vmatprep.subr.bf16.mxu0 %v2799_v11 }
0x1444   :  { %2551 = vmatpush3.bf16.msra.mxu0 %v2663_v55 }
0x1445   :  { %2552 = vmatprep.subr.bf16.mxu0 %v2799_v11 }
0x1448   :  { %2553 = vmatpush3.bf16.msra.mxu0 %v2664_v51 }
0x1449   :  { %2554 = vmatprep.subr.bf16.mxu0 %v2799_v11 }
0x144c   :  { %2555 = vmatpush3.bf16.msra.mxu0 %v2665_v54 }
0x144d   :  { %2556 = vmatprep.subr.bf16.mxu0 %v2799_v11 }
0x1450   :  { %2557 = vmatpush3.bf16.msra.mxu0 %v2666_v38 }
0x1451   :  { %2558 = vmatprep.subr.bf16.mxu0 %v2799_v11 }
0x1454   :  { %2559 = vmatpush3.bf16.msra.mxu0 %v2667_v39 }
0x1455   :  { %2560 = vmatprep.subr.bf16.mxu0 %v2799_v11 }
0x1458   :  { %2561 = vmatpush3.bf16.msra.mxu0 %v2668_v40 }
0x1459   :  { %2562 = vmatprep.subr.bf16.mxu0 %v2799_v11 }
0x145c   :  { %2563 = vmatpush3.bf16.msra.mxu0 %v2669_v41 }
0x1512   :  { %v1799_v33 = vpop.f32.mrb[44].mxu0 }
0x1513   :  { %v1800_v56 = vadd.f32 %v1799_v33, %v1749_v25  ;;  %v2538_v58 = vpop.f32.mrb[45].mxu0 }
0x1514   :  { %v1802_v59 = vpop.f32.mrb[46].mxu0 }
0x1515   :  { %v3334_v63 = vadd.f32 %v1800_v56, %v3177_v57  ;;  %v1803_v0 = vadd.f32 %v1802_v59, %v1749_v25  ;;  %v2539_v52 = vpop.f32.mrb[47].mxu0 }
0x1517   :  { %v3337_v1 = vadd.f32 %v1803_v0, %v3180_v61  ;;  %v1808_v43 = vsel %vm154_vm3, %v3334_v63, 0.0  ;;  %v1816_v12 = vmul.f32 %v3334_v63, %v3334_v63 }
0x1518   :  { %1809 = vadd.xlane.f32.xlu1 %v1808_v43 }
0x1519   :  { %v1811_v23 = vsel %vm154_vm3, %v3337_v1, 0.0  ;;  %v1817_v62 = vmul.f32 %v3337_v1, %v3337_v1  ;;  %v1818_v61 = vsel %vm154_vm3, %v1816_v12, 0.0 }
0x151a   :  { %1812 = vadd.xlane.f32.xlu0 %v1811_v23 }
0x151b   :  { %v1821_v57 = vsel %vm154_vm3, %v1817_v62, 0.0 }
0x151c   :  { %1822 = vadd.xlane.f32.xlu1 %v1821_v57 }
0x151e   :  { %1819 = vadd.xlane.f32.xlu0 %v1818_v61 }
0x15a5   :  { %v1810_v5 = vpop.xlane.xlu1 %1809 }
0x15a6   :  { %v1814_v7 = vmul.f32 0.03125, %v1810_v5 }
0x15a7   :  { %v1813_v6 = vpop.xlane.xlu0 %1812 }
0x15a8   :  { %v1815_v16 = vmul.f32 0.03125, %v1813_v6  ;;  %v1826_v13 = vmul.f32 %v1814_v7, %v1814_v7  ;;  %v1830_v28 = vsub.f32 %v3334_v63, %v1814_v7 }
0x15a9   :  { %v1823_v8 = vpop.xlane.xlu1 %1822 }
0x15aa   :  { %v1827_v20 = vmul.f32 %v1815_v16, %v1815_v16  ;;  %v1825_v9 = vmul.f32 0.03125, %v1823_v8  ;;  %v1831_v21 = vsub.f32 %v3337_v1, %v1815_v16  ;;  %v1955_v16 = vrot.slane %v3203_v24, %v1007_v45  ;;  %v2670_v24 = vld [vmem:[%s3451_s10] sm:$0xff]  }
0x15ab   :  { %v1820_v10 = vpop.xlane.xlu0 %1819 }
0x15ac   :  { %v1829_v14 = vsub.f32 %v1825_v9, %v1827_v20  ;;  %v1824_v15 = vmul.f32 0.03125, %v1820_v10 }
0x15ae   :  { %v1833_v60 = vadd.f32 1e-05, %v1829_v14  ;;  %v1828_v18 = vsub.f32 %v1824_v15, %v1826_v13 }
0x15b0   :  { %2752 = vrsqrt.f32 %v1833_v60  ;;  %v1832_v19 = vadd.f32 1e-05, %v1828_v18 }
0x15b2   :  { %2754 = vrsqrt.f32 %v1832_v19 }
0x15ba   :  { %v2753_v26 = vpop.eup %2752 }
0x15bb   :  { %v1837_v29 = vmul.f32 %v2753_v26, %v1831_v21 }
0x15bc   :  { %v2755_v30 = vpop.eup %2754 }
0x15bd   :  { %v1836_v31 = vmul.f32 %v2755_v30, %v1830_v28  ;;  %v1843_v27 = vmul.f32 %v1841_v22, %v1837_v29 }
0x15bf   :  { %v1842_v34 = vmul.f32 %v1841_v22, %v1836_v31  ;;  %v1849_v36 = vadd.f32 %v1847_v32, %v1843_v27 }
0x15c1   :  { %v1848_v35 = vadd.f32 %v1847_v32, %v1842_v34 }
0x15c3   :  { %v1850_v37 = vpack.c.bf16 %v1849_v36, %v1848_v35 }
0x15c5   :  { %2545 = vmatmul.mubr.msk.bf16.vlgmr.msra.gmra.mrb[44].mxu1 %vm154_vm3, %v1850_v37 }
0x15c6   :  { %2572 = vmatprep.mubr.msk.bf16.mxu1 %vm2800_vm4, %v2799_v11  ;;  %2569 = vmatpush3.bf16.msra.mxu1 %v2670_v24 }
0x15c7   :  { %2570 = vmatprep.subr.bf16.mxu1 %v2799_v11  ;;  %v2278_v11 = vld [vmem:[%s3450_s9] ss:$0 sm:$0xff] }
0x1698   :  { %v1909_v3 = vpop.f32.mrb[44].mxu1 }
0x1699   :  { %v1910_v44 = vadd.f32 %v1909_v3, %v1859_v42  ;;  %v2546_v46 = vpop.f32.mrb[45].mxu1  ;;  %v2279_v3 = vld [vmem:[%s3450_s9 + $0x1] ss:$0 sm:$0xff]  ;;  %s2815_s9 = smov [#allocation2]  }
0x169a   :  { %v1912_v47 = vpop.f32.mrb[46].mxu1 }
0x169b   :  { %v1916_v49 = vmul.f32 %v1910_v44, %v1910_v44  ;;  %v1913_v53 = vadd.f32 %v1912_v47, %v1859_v42  ;;  %v2547_v25 = vpop.f32.mrb[47].mxu1 }
0x169d   :  { %v1918_v33 = vmul.f32 %v1916_v49, %v1910_v44  ;;  %v1917_v56 = vmul.f32 %v1913_v53, %v1913_v53 }
0x169f   :  { %v1920_v58 = vmul.f32 0.044715, %v1918_v33  ;;  %v1919_v59 = vmul.f32 %v1917_v56, %v1913_v53 }
0x16a1   :  { %v1922_v0 = vadd.f32 %v1920_v58, %v1910_v44  ;;  %v1921_v52 = vmul.f32 0.044715, %v1919_v59 }
0x16a3   :  { %v1924_v43 = vmul.f32 0.7978846, %v1922_v0  ;;  %v1923_v23 = vadd.f32 %v1921_v52, %v1913_v53 }
0x16a5   :  { %2756 = vtanh.f32 %v1924_v43  ;;  %v1925_v62 = vmul.f32 0.7978846, %v1923_v23 }
0x16a7   :  { %2758 = vtanh.f32 %v1925_v62 }
0x16af   :  { %v2757_v12 = vpop.eup %2756 }
0x16b0   :  { %v1928_v17 = vadd.f32 1.0, %v2757_v12 }
0x16b1   :  { %v2759_v57 = vpop.eup %2758 }
0x16b2   :  { %v1930_v61 = vmul.f32 0.5, %v1928_v17  ;;  %v1929_v2 = vadd.f32 1.0, %v2759_v57 }
0x16b4   :  { %v1931_v4 = vmul.f32 0.5, %v1929_v2  ;;  %v1932_v5 = vmul.f32 %v1930_v61, %v1910_v44 }
0x16b6   :  { %v1933_v6 = vmul.f32 %v1931_v4, %v1913_v53  ;;  %v2280_v53 = vld [vmem:[%s3452_s11] ss:$0 sm:$0xff]  ;;  %s2184_s11 = sshll.u32 %s2815_s9, 4  ;;  %s2185_s11 = int_to_ptr.vmem [resolvable:$true] %s2184_s11 }
0x16b7   :  { %s2774_s22 = scalar_lea.vmem %s2185_s11, 256  ;;  %p2779_p1 = scmp.lt.s32.totalorder %s2185_s11, %s2185_s11 }
0x16b8   :  { %v1934_v7 = vpack.c.bf16 %v1933_v6, %v1932_v5  ;;  %p2775_p0 = scmp.ne.s32.totalorder %s2185_s11, %s2774_s22  ;;  %p2780_p2 = scmp.lt.s32.totalorder %s2774_s22, %s2774_s22 }
0x16ba   :  { %2565 = vmatmul.mubr.bf16.vlgmr.msra.gmra.mrb[48].mxu0 %v1934_v7  ;;  %p2781_p3 = por %p2780_p2, %p2779_p1 }
0x16bc   :  { %p2782_p4 = pnand %p2781_p3, %p2775_p0 }
0x178d   :  { %v2038_v8 = vpop.f32.mrb[48].mxu0 }
0x178e   :  { %v2039_v20 = vadd.f32 %v2038_v8, %v1955_v16  ;;  %v2566_v9 = vpop.f32.mrb[49].mxu0 }
0x178f   :  { %v2041_v10 = vpop.f32.mrb[50].mxu0 }
0x1790   :  { %v2045_v13 = vadd.f32 %v2039_v20, %v3334_v63  ;;  %v2042_v14 = vadd.f32 %v2041_v10, %v1955_v16  ;;  %v2567_v15 = vpop.f32.mrb[51].mxu0  ;;  %v2671_v63 = vld [vmem:[%s3451_s10 + $0x8] sm:$0xff]  }
0x1791   :  { %2571 = vmatpush3.bf16.msra.mxu1 %v2671_v63 }
0x1792   :  { %v2046_v60 = vadd.f32 %v2042_v14, %v3337_v1  ;;  %v2049_v18 = vsel %vm154_vm3, %v2045_v13, 0.0  ;;  %v2057_v19 = vmul.f32 %v2045_v13, %v2045_v13 }
0x1793   :  { %2050 = vadd.xlane.f32.xlu0 %v2049_v18 }
0x1794   :  { %v2052_v21 = vsel %vm154_vm3, %v2046_v60, 0.0  ;;  %v2058_v22 = vmul.f32 %v2046_v60, %v2046_v60  ;;  %v2059_v50 = vsel %vm154_vm3, %v2057_v19, 0.0 }
0x1795   :  { %2053 = vadd.xlane.f32.xlu1 %v2052_v21 }
0x1796   :  { %v2062_v45 = vsel %vm154_vm3, %v2058_v22, 0.0 }
0x1797   :  { %2060 = vadd.xlane.f32.xlu0 %v2059_v50 }
0x1799   :  { %2063 = vadd.xlane.f32.xlu1 %v2062_v45 }
0x1820   :  { %v2051_v1 = vpop.xlane.xlu0 %2050 }
0x1821   :  { %v2055_v26 = vmul.f32 0.03125, %v2051_v1 }
0x1822   :  { %v2054_v28 = vpop.xlane.xlu1 %2053 }
0x1823   :  { %v2056_v29 = vmul.f32 0.03125, %v2054_v28  ;;  %v2067_v31 = vmul.f32 %v2055_v26, %v2055_v26  ;;  %v2071_v51 = vsub.f32 %v2045_v13, %v2055_v26 }
0x1824   :  { %v2061_v30 = vpop.xlane.xlu0 %2060 }
0x1825   :  { %v2065_v27 = vmul.f32 0.03125, %v2061_v30  ;;  %v2068_v34 = vmul.f32 %v2056_v29, %v2056_v29  ;;  %v2072_v38 = vsub.f32 %v2046_v60, %v2056_v29 }
0x1826   :  { %v2064_v32 = vpop.xlane.xlu1 %2063 }
0x1827   :  { %v2069_v35 = vsub.f32 %v2065_v27, %v2067_v31  ;;  %v2066_v36 = vmul.f32 0.03125, %v2064_v32 }
0x1829   :  { %v2073_v37 = vadd.f32 1e-05, %v2069_v35  ;;  %v2070_v48 = vsub.f32 %v2066_v36, %v2068_v34 }
0x182b   :  { %2760 = vrsqrt.f32 %v2073_v37  ;;  %v2074_v55 = vadd.f32 1e-05, %v2070_v48 }
0x182d   :  { %2762 = vrsqrt.f32 %v2074_v55 }
0x1835   :  { %v2761_v54 = vpop.eup %2760 }
0x1836   :  { %v2077_v39 = vmul.f32 %v2761_v54, %v2071_v51 }
0x1837   :  { %v2763_v40 = vpop.eup %2762 }
0x1838   :  { %v2078_v41 = vmul.f32 %v2763_v40, %v2072_v38  ;;  %v2083_v42 = vmul.f32 %v2278_v11, %v2077_v39 }
0x183a   :  { %v2084_v44 = vmul.f32 %v2278_v11, %v2078_v41  ;;  %v2089_v46 = vadd.f32 %v2279_v3, %v2083_v42 }
0x183c   :  { %v2090_v47 = vadd.f32 %v2279_v3, %v2084_v44 }
0x183e   :  { %v2091_v49 = vpack.c.bf16 %v2090_v47, %v2089_v46 }
0x1840   :  { %2573 = vmatmul.mubr.msk.bf16.vlgmr.msra.gmra.mrb[48].mxu1 %vm154_vm3, %v2091_v49 }
0x1913   :  { %v2152_v25 = vpop.f32.mrb[48].mxu1 }
0x1914   :  { %v2153_v33 = vadd.f32 %v2280_v53, %v2152_v25  ;;  %v2574_v56 = vpop.f32.mrb[49].mxu1 }
0x1915   :  { %v2155_v58 = vpop.f32.mrb[50].mxu1 }
0x1916   :  { %v2156_v59 = vadd.f32 %v2280_v53, %v2155_v58  ;;  %2159 = vmax.xlane.f32.xlu0 %v2153_v33  ;;  %v2575_v0 = vpop.f32.mrb[51].mxu1 }
0x1918   :  { %2161 = vmax.xlane.f32.xlu1 %v2156_v59 }
0x19a3   :  { %v2160_v52 = vpop.xlane.xlu0 %2159 }
0x19a4   :  { %v2163_v43 = vsub.f32 %v2153_v33, %v2160_v52 }
0x19a5   :  { %v2162_v23 = vpop.xlane.xlu1 %2161 }
0x19a6   :  { %v2165_v62 = vmul.f32 1.442695, %v2163_v43  ;;  %v2164_v12 = vsub.f32 %v2156_v59, %v2162_v23 }
0x19a8   :  { %2764 = vpow2.f32 %v2165_v62  ;;  %v2167_v17 = vmul.f32 1.442695, %v2164_v12 }
0x19aa   :  { %2766 = vpow2.f32 %v2167_v17 }
0x19b2   :  { %v2765_v57 = vpop.eup %2764 }
0x19b3   :  { %2169 = vadd.xlane.f32.xlu0 %v2765_v57 }
0x19b4   :  { %v2767_v61 = vpop.eup %2766 }
0x19b5   :  { %2171 = vadd.xlane.f32.xlu1 %v2767_v61 }
0x1a40   :  { %v2170_v2 = vpop.xlane.xlu0 %2169 }
0x1a41   :  { %2768 = vrcp.f32 %v2170_v2 }
0x1a42   :  { %v2172_v4 = vpop.xlane.xlu1 %2171 }
0x1a43   :  { %2770 = vrcp.f32 %v2172_v4 }
0x1a4b   :  { %v2769_v5 = vpop.eup %2768 }
0x1a4c   :  { %v2174_v6 = vmul.f32 %v2769_v5, %v2765_v57 }
0x1a4d   :  { %v2771_v7 = vpop.eup %2770 }
0x1a4e   :  { %v2176_v16 = vmul.f32 %v2771_v7, %v2767_v61  ;;  %2177 = vst [vmem:[#allocation2] sm:$0xff] %v2174_v6 }
0x1a50   :  { %2178 = vst [vmem:[#allocation2 + $0x8] sm:$0xff] %v2176_v16 }
0x1a51   :  { %2785 = shalt.err (!%p2782_p4)
}
0x1a52   :  { %s2786_s24 = scalar_lea.hbm %s3453_s12, 256 }
0x1a53   :  { %p2787_p5 = scmp.ne.s32.totalorder %s3453_s12, %s2786_s24  ;;  %p2790_p6 = scmp.lt.u32.totalorder %s2786_s24, %s3453_s12 }
0x1a55   :  { %p2792_p7 = pnand %p2790_p6, %p2787_p5 }
0x1a57   :  { %2795 = shalt.err (!%p2792_p7)
}
0x1a58   :  { %s2816_s29 = smov 128  }
0x1a59   :  { %2190 = dma.vmem_to_hbm [thread:$0]  %s2185_s11, 256, %s3453_s12, [#allocation3], %s2816_s29, %s2816_s29, %s2812_s26  }
0x1a5a   :  { %2796 = dma.done.wait [#allocation3], 256  }
0x1a5b   :  { %2797 = vsyncadd [#allocation3], 4294967040 }
0x1a5c   :  { %2194 = vsyncpa [#allocation3], 1 }

</bundles_post_ra>
